<compile_context>
chip_gen: v5e
topology: v5e:2x2
jax: 0.10.0
libtpu: 0.0.40
codegen_flags: <defaults>
</compile_context>

<pallas_src>
from functools import partial

import jax
import jax.numpy as jnp
from jax.experimental import pallas as pl
from jax.experimental.pallas import tpu as pltpu

BIG = 1e30
NEG_SLOPE = 0.2   # nn.LeakyReLU(negative_slope=0.2)
BN_EPS = 1e-5     # nn.BatchNorm1d default eps
PREC = jax.lax.Precision.HIGHEST


def _round_up(a, b):
    return ((a + b - 1) // b) * b


def _leaky(v):
    return jnp.where(v > 0, v, NEG_SLOPE * v)


# ---------------------------------------------------------------------------
# Kernel 1: per-N-tile KNN (MXU distance matrix) + feature gather + conv1/leaky
#   == get_atom_features followed by conv1 + LeakyReLU (pre-BN1)
# ---------------------------------------------------------------------------
def _knn_conv1_kernel(x_ref, xsq_ref, xb_ref, y_ref, ysq_ref, yb_ref,
                      atom_ref, w1a_ref, w1d_ref, b1_ref, h_ref, *, K):
    x = x_ref[...]            # [TN, 3]
    y = y_ref[...]            # [M, 3]   (VMEM-resident across the N grid)
    atom = atom_ref[...]      # [M, D]
    w1a = w1a_ref[...]        # [D, D]   conv1 weight rows for the chem feats
    w1d = w1d_ref[...]        # [1, D]   conv1 weight row for the 1/dist feat
    b1 = b1_ref[...]          # [1, D]

    TN = x.shape[0]
    M = y.shape[0]

    # d2 = |x|^2 + |y|^2 - 2 x.y^T : one MXU matmul + VPU adds.
    # Clamp tiny negative values caused by floating-point cancellation.
    xy = jax.lax.dot_general(x, y, (((1,), (1,)), ((), ())),
                             precision=PREC,
                             preferred_element_type=jnp.float32)       # [TN, M]
    d2 = jnp.maximum(xsq_ref[...] + ysq_ref[...] - 2.0 * xy, 0.0)      # [TN, M]

    # restrict to same-batch pairs (diagonal_ranges semantics)
    same = xb_ref[...] == yb_ref[...]                                  # [TN, M]
    d_work = jnp.where(same, d2, BIG)

    # column index plane (hoisted out of the K loop)
    lane = jax.lax.broadcasted_iota(jnp.int32, (TN, M), 1).astype(jnp.float32)

    # iterative arg-k-min: K passes of (argmin, gather, mask-out). K is small
    # (4-16) so the Python unroll is fine.
    for t in range(K):
        minval = jnp.min(d_work, axis=1, keepdims=True)                # [TN, 1]
        idx = jnp.min(jnp.where(d_work == minval, lane, float(M)),
                      axis=1, keepdims=True)                           # [TN, 1]
        onehot = (lane == idx).astype(jnp.float32)                     # [TN, M]

        # gather selected atom features via one-hot matmul (MXU gather);
        # minval IS the selected squared distance (no extra row-reduce).
        g = jnp.dot(onehot, atom, precision=PREC,
                    preferred_element_type=jnp.float32)                # [TN, D]
        invd = 1.0 / minval                                            # [TN, 1]

        # fused conv1 + LeakyReLU; weight split avoids materializing the
        # (D+1)-wide concat. BN1 needs global stats -> done in kernel 2.
        pre = (jnp.dot(g, w1a, precision=PREC,
                       preferred_element_type=jnp.float32)
               + invd * w1d + b1)                                      # [TN, D]
        h_ref[t, :, :] = _leaky(pre)

        # remove the selected neighbor for the next pass
        d_work = jnp.where(onehot > 0.5, BIG, d_work)


# ---------------------------------------------------------------------------
# Kernel 2: bn1 -> sum_k, conv2 -> LeakyReLU -> bn2 -> sum_k, conv3
#   (single block: training-mode BatchNorm requires global batch statistics)
# ---------------------------------------------------------------------------
def _mlp_kernel(h_ref, g1_ref, be1_ref, w2_ref, b2_ref, g2_ref, be2_ref,
                w3a_ref, w3b_ref, b3_ref, out_ref, *, K):
    # per-neighbor blocks, each [N, D] = leaky(conv1(feat_k))
    blocks = [h_ref[t] for t in range(K)]
    n_rows = blocks[0].shape[0] * K

    # ---- bn1 (training-mode batch statistics over all N*K rows) ----
    mean1 = sum(jnp.sum(b, axis=0, keepdims=True) for b in blocks) / n_rows
    var1 = sum(jnp.sum((b - mean1) ** 2, axis=0, keepdims=True)
               for b in blocks) / n_rows
    scale1 = g1_ref[...] * jax.lax.rsqrt(var1 + BN_EPS)
    hb = [scale1 * (b - mean1) + be1_ref[...] for b in blocks]

    fx1 = sum(hb)                                                      # [N, D]

    # ---- conv2 -> LeakyReLU ----
    a2 = [_leaky(jnp.dot(b, w2_ref[...], precision=PREC,
                         preferred_element_type=jnp.float32) + b2_ref[...])
          for b in hb]

    # ---- bn2 ----
    mean2 = sum(jnp.sum(b, axis=0, keepdims=True) for b in a2) / n_rows
    var2 = sum(jnp.sum((b - mean2) ** 2, axis=0, keepdims=True)
               for b in a2) / n_rows
    scale2 = g2_ref[...] * jax.lax.rsqrt(var2 + BN_EPS)
    h2b = [scale2 * (b - mean2) + be2_ref[...] for b in a2]

    fx2 = sum(h2b)                                                     # [N, D]

    # ---- conv3 on concat([fx1, fx2]) == fx1 @ w3[:D] + fx2 @ w3[D:] ----
    out_ref[...] = (jnp.dot(fx1, w3a_ref[...], precision=PREC,
                            preferred_element_type=jnp.float32)
                    + jnp.dot(fx2, w3b_ref[...], precision=PREC,
                              preferred_element_type=jnp.float32)
                    + b3_ref[...])


# ---------------------------------------------------------------------------
# Wrapper
# ---------------------------------------------------------------------------
def atom_embedding_forward(x, y, y_atomtypes, x_batch, y_batch, params, k):
    N = x.shape[0]
    M = y.shape[0]
    D = y_atomtypes.shape[1]

    # Tile over query points. 256 rows/tile keeps the handful of live [TN, M]
    # f32 planes comfortably inside v7x's smaller (64 MiB) VMEM while being
    # large enough to hide per-step overhead on v5e/v6e.
    TN = min(256, _round_up(N, 8))
    Npad = _round_up(N, TN)
    pad = Npad - N

    xf = jnp.pad(x, ((0, pad), (0, 0)))
    # padded rows get batch id -1 -> match no atoms -> dropped before kernel 2
    xb = jnp.pad(x_batch.astype(jnp.float32).reshape(N, 1),
                 ((0, pad), (0, 0)), constant_values=-1.0)
    xsq = jnp.sum(xf * xf, axis=1, keepdims=True)            # [Npad, 1]
    ysq = jnp.sum(y * y, axis=1).reshape(1, M)                # [1, M]
    yb = y_batch.astype(jnp.float32).reshape(1, M)

    w1 = params["w1"]
    w1a, w1d = w1[:D, :], w1[D:D + 1, :]
    w3 = params["w3"]
    w3a, w3b = w3[:D, :], w3[D:2 * D, :]

    grid = (Npad // TN,)

    # KNN + gather + conv1 + LeakyReLU  ->  [K, Npad, D]
    h = pl.pallas_call(
        partial(_knn_conv1_kernel, K=k),
        out_shape=jax.ShapeDtypeStruct((k, Npad, D), jnp.float32),
        grid=grid,
        in_specs=[
            pl.BlockSpec((TN, 3), lambda i: (i, 0)),          # x tile
            pl.BlockSpec((TN, 1), lambda i: (i, 0)),          # |x|^2 tile
            pl.BlockSpec((TN, 1), lambda i: (i, 0)),          # x batch tile
            pl.BlockSpec((M, 3), lambda i: (0, 0)),           # y (resident)
            pl.BlockSpec((1, M), lambda i: (0, 0)),           # |y|^2 (resident)
            pl.BlockSpec((1, M), lambda i: (0, 0)),           # y batch (resident)
            pl.BlockSpec((M, D), lambda i: (0, 0)),           # atom feats (resident)
            pl.BlockSpec((D, D), lambda i: (0, 0)),           # w1 (chem rows)
            pl.BlockSpec((1, D), lambda i: (0, 0)),           # w1 (dist row)
            pl.BlockSpec((1, D), lambda i: (0, 0)),           # b1
        ],
        out_specs=pl.BlockSpec((k, TN, D), lambda i: (0, i, 0)),
        compiler_params=pltpu.CompilerParams(
            dimension_semantics=("parallel",)),
    )(xf, xsq, xb, y, ysq, yb, y_atomtypes, w1a, w1d, params["b1"])

    # drop padded rows BEFORE batch-norm statistics are taken
    h = h[:, :N, :]

    vmem = pl.BlockSpec(memory_space=pltpu.MemorySpace.VMEM)
    out = pl.pallas_call(
        partial(_mlp_kernel, K=k),
        out_shape=jax.ShapeDtypeStruct((N, D), jnp.float32),
        in_specs=[vmem] * 10,
        out_specs=vmem,
    )(h, params["g1"], params["be1"], params["w2"], params["b2"],
      params["g2"], params["be2"], w3a, w3b, params["b3"])
    return out


# ---------------------------------------------------------------------------
# Pure-JAX reference (mirrors the PyTorch forward)
# ---------------------------------------------------------------------------
def reference_forward(x, y, atomtype, x_batch, y_batch, p, k):
    D = atomtype.shape[1]
    d2 = jnp.sum((x[:, None, :] - y[None, :, :]) ** 2, axis=-1)
    mask = x_batch[:, None] == y_batch[None, :]
    d2m = jnp.where(mask, d2, BIG)
    _, idx = jax.lax.top_k(-d2m, k)                       # k smallest distances
    x_ik = y[idx]                                         # [N, k, 3]
    dists = jnp.sum((x[:, None, :] - x_ik) ** 2, axis=-1)
    feat = jnp.concatenate([atomtype[idx], 1.0 / dists[..., None]], axis=-1)

    def bn(v, g, b):
        m = v.mean(0, keepdims=True)
        var = ((v - m) ** 2).mean(0, keepdims=True)
        return g * (v - m) / jnp.sqrt(var + BN_EPS) + b

    h = jnp.dot(feat.reshape(-1, D + 1), p["w1"], precision=PREC) + p["b1"]
    h = bn(_leaky(h), p["g1"], p["be1"])
    fx1 = h.reshape(-1, k, D).sum(1)
    h2 = jnp.dot(h, p["w2"], precision=PREC) + p["b2"]
    h2 = bn(_leaky(h2), p["g2"], p["be2"])
    fx2 = h2.reshape(-1, k, D).sum(1)
    cat = jnp.concatenate([fx1, fx2], axis=1)
    return jnp.dot(cat, p["w3"], precision=PREC) + p["b3"]


if __name__ == "__main__":
    key = jax.random.PRNGKey(0)
    N, M, D, K = 16, 32, 8, 4          # N query points, M atoms, chem_dims, knn

    ks = jax.random.split(key, 8)
    x = jax.random.normal(ks[0], (N, 3), jnp.float32)
    y = jax.random.normal(ks[1], (M, 3), jnp.float32)
    y_atomtypes = jax.random.normal(ks[2], (M, D), jnp.float32)
    x_batch = jnp.concatenate([jnp.zeros(N // 2, jnp.int32), jnp.ones(N - N // 2, jnp.int32)])
    y_batch = jnp.concatenate([jnp.zeros(M // 2, jnp.int32), jnp.ones(M - M // 2, jnp.int32)])

    # Deterministic parameter init (Linear: U(-1/sqrt(fan_in), 1/sqrt(fan_in));
    # BatchNorm: gamma=1, beta=0). Weights stored as [in, out].
    def lin_init(k_, fan_in, fan_out):
        bound = 1.0 / (fan_in ** 0.5)
        kw, kb = jax.random.split(k_)
        w = jax.random.uniform(kw, (fan_in, fan_out), jnp.float32, -bound, bound)
        b = jax.random.uniform(kb, (1, fan_out), jnp.float32, -bound, bound)
        return w, b

    w1, b1 = lin_init(ks[3], D + 1, D)
    w2, b2 = lin_init(ks[4], D, D)
    w3, b3 = lin_init(ks[5], 2 * D, D)
    params = dict(
        w1=w1, b1=b1, w2=w2, b2=b2, w3=w3, b3=b3,
        g1=jnp.ones((1, D), jnp.float32), be1=jnp.zeros((1, D), jnp.float32),
        g2=jnp.ones((1, D), jnp.float32), be2=jnp.zeros((1, D), jnp.float32),
    )

    out = atom_embedding_forward(x, y, y_atomtypes, x_batch, y_batch, params, K)
    out = jax.block_until_ready(out)

    ref = reference_forward(x, y, y_atomtypes, x_batch, y_batch, params, K)
    assert out.shape == (N, D), out.shape
    assert jnp.allclose(out, ref, rtol=2e-3, atol=2e-3), (out, ref)
    print("KERNEL_OK")
</pallas_src>

<mosaic_0001>
module attributes {stable_mosaic.version = 11 : i64} {
  func.func @_knn_conv1_kernel(%arg0: i32, %arg1: memref<16x3xf32, #tpu.memory_space<vmem>>, %arg2: memref<16x1xf32, #tpu.memory_space<vmem>>, %arg3: memref<16x1xf32, #tpu.memory_space<vmem>>, %arg4: memref<32x3xf32, #tpu.memory_space<vmem>>, %arg5: memref<1x32xf32, #tpu.memory_space<vmem>>, %arg6: memref<1x32xf32, #tpu.memory_space<vmem>>, %arg7: memref<32x8xf32, #tpu.memory_space<vmem>>, %arg8: memref<8x8xf32, #tpu.memory_space<vmem>>, %arg9: memref<1x8xf32, #tpu.memory_space<vmem>>, %arg10: memref<1x8xf32, #tpu.memory_space<vmem>>, %arg11: memref<4x16x8xf32, #tpu.memory_space<vmem>>) attributes {dimension_semantics = [#tpu.dimension_semantics<parallel>], iteration_bounds = array<i64: 1>, scalar_prefetch = 0 : i64, scratch_operands = 0 : i64, tpu.core_type = #tpu.core_type<tc>, window_params = [{transform_indices = @transform_0, window_bounds = array<i64: 16, 3>}, {transform_indices = @transform_1, window_bounds = array<i64: 16, 1>}, {transform_indices = @transform_2, window_bounds = array<i64: 16, 1>}, {pipeline_mode = #tpu.pipeline_mode<synchronous>, transform_indices = @transform_3, window_bounds = array<i64: 32, 3>}, {pipeline_mode = #tpu.pipeline_mode<synchronous>, transform_indices = @transform_4, window_bounds = array<i64: 1, 32>}, {pipeline_mode = #tpu.pipeline_mode<synchronous>, transform_indices = @transform_5, window_bounds = array<i64: 1, 32>}, {pipeline_mode = #tpu.pipeline_mode<synchronous>, transform_indices = @transform_6, window_bounds = array<i64: 32, 8>}, {pipeline_mode = #tpu.pipeline_mode<synchronous>, transform_indices = @transform_7, window_bounds = array<i64: 8, 8>}, {pipeline_mode = #tpu.pipeline_mode<synchronous>, transform_indices = @transform_8, window_bounds = array<i64: 1, 8>}, {pipeline_mode = #tpu.pipeline_mode<synchronous>, transform_indices = @transform_9, window_bounds = array<i64: 1, 8>}, {transform_indices = @transform_10, window_bounds = array<i64: 4, 16, 8>}]} {
    %c0 = arith.constant 0 : index
    %c0_0 = arith.constant 0 : index
    %0 = vector.load %arg1[%c0, %c0_0] : memref<16x3xf32, #tpu.memory_space<vmem>>, vector<16x3xf32>
    %c0_1 = arith.constant 0 : index
    %c0_2 = arith.constant 0 : index
    %1 = vector.load %arg4[%c0_1, %c0_2] : memref<32x3xf32, #tpu.memory_space<vmem>>, vector<32x3xf32>
    %c0_3 = arith.constant 0 : index
    %c0_4 = arith.constant 0 : index
    %2 = vector.load %arg7[%c0_3, %c0_4] : memref<32x8xf32, #tpu.memory_space<vmem>>, vector<32x8xf32>
    %c0_5 = arith.constant 0 : index
    %c0_6 = arith.constant 0 : index
    %3 = vector.load %arg8[%c0_5, %c0_6] : memref<8x8xf32, #tpu.memory_space<vmem>>, vector<8x8xf32>
    %c0_7 = arith.constant 0 : index
    %c0_8 = arith.constant 0 : index
    %4 = vector.load %arg9[%c0_7, %c0_8] : memref<1x8xf32, #tpu.memory_space<vmem>>, vector<1x8xf32>
    %c0_9 = arith.constant 0 : index
    %c0_10 = arith.constant 0 : index
    %5 = vector.load %arg10[%c0_9, %c0_10] : memref<1x8xf32, #tpu.memory_space<vmem>>, vector<1x8xf32>
    %cst = arith.constant dense<0.000000e+00> : vector<16x32xf32>
    %6 = tpu.matmul %0, %1, %cst {dimension_numbers = #tpu.dot_dimension_numbers<[1], [1], [0], [0], [0, 0, 1, 0], [], []>, precision = #tpu.contract_precision<fp32>} : vector<16x3xf32>, vector<32x3xf32>, vector<16x32xf32> -> vector<16x32xf32>
    %c0_11 = arith.constant 0 : index
    %c0_12 = arith.constant 0 : index
    %7 = vector.load %arg2[%c0_11, %c0_12] : memref<16x1xf32, #tpu.memory_space<vmem>>, vector<16x1xf32>
    %c0_13 = arith.constant 0 : index
    %c0_14 = arith.constant 0 : index
    %8 = vector.load %arg5[%c0_13, %c0_14] : memref<1x32xf32, #tpu.memory_space<vmem>>, vector<1x32xf32>
    %9 = vector.broadcast %7 : vector<16x1xf32> to vector<16x32xf32>
    %10 = vector.broadcast %8 : vector<1x32xf32> to vector<16x32xf32>
    %11 = arith.addf %9, %10 : vector<16x32xf32>
    %cst_15 = arith.constant 2.000000e+00 : f32
    %12 = vector.broadcast %cst_15 : f32 to vector<16x32xf32>
    %13 = arith.mulf %12, %6 : vector<16x32xf32>
    %14 = arith.subf %11, %13 : vector<16x32xf32>
    %cst_16 = arith.constant 0.000000e+00 : f32
    %15 = vector.broadcast %cst_16 : f32 to vector<16x32xf32>
    %16 = arith.maximumf %14, %15 : vector<16x32xf32>
    %c0_17 = arith.constant 0 : index
    %c0_18 = arith.constant 0 : index
    %17 = vector.load %arg3[%c0_17, %c0_18] : memref<16x1xf32, #tpu.memory_space<vmem>>, vector<16x1xf32>
    %c0_19 = arith.constant 0 : index
    %c0_20 = arith.constant 0 : index
    %18 = vector.load %arg6[%c0_19, %c0_20] : memref<1x32xf32, #tpu.memory_space<vmem>>, vector<1x32xf32>
    %19 = vector.broadcast %17 : vector<16x1xf32> to vector<16x32xf32>
    %20 = vector.broadcast %18 : vector<1x32xf32> to vector<16x32xf32>
    %21 = arith.cmpf oeq, %19, %20 : vector<16x32xf32>
    %cst_21 = arith.constant 1.000000e+30 : f32
    %22 = vector.broadcast %cst_21 : f32 to vector<16x32xf32>
    %23 = arith.select %21, %16, %22 : vector<16x32xi1>, vector<16x32xf32>
    %24 = tpu.iota {dimensions = array<i32: 1>} : vector<16x32xi32>
    %25 = arith.sitofp %24 : vector<16x32xi32> to vector<16x32xf32>
    %cst_22 = arith.constant dense<0x7F800000> : vector<16xf32>
    %26 = vector.multi_reduction <minimumf>, %23, %cst_22 [1] : vector<16x32xf32> to vector<16xf32>
    %27 = vector.shape_cast %26 : vector<16xf32> to vector<16x1xf32>
    %28 = vector.broadcast %27 : vector<16x1xf32> to vector<16x32xf32>
    %29 = arith.cmpf oeq, %23, %28 : vector<16x32xf32>
    %cst_23 = arith.constant 3.200000e+01 : f32
    %30 = vector.broadcast %cst_23 : f32 to vector<16x32xf32>
    %31 = arith.select %29, %25, %30 : vector<16x32xi1>, vector<16x32xf32>
    %cst_24 = arith.constant dense<0x7F800000> : vector<16xf32>
    %32 = vector.multi_reduction <minimumf>, %31, %cst_24 [1] : vector<16x32xf32> to vector<16xf32>
    %33 = vector.shape_cast %32 : vector<16xf32> to vector<16x1xf32>
    %34 = vector.broadcast %33 : vector<16x1xf32> to vector<16x32xf32>
    %35 = arith.cmpf oeq, %25, %34 : vector<16x32xf32>
    %36 = arith.extui %35 : vector<16x32xi1> to vector<16x32xi32>
    %37 = arith.sitofp %36 : vector<16x32xi32> to vector<16x32xf32>
    %cst_25 = arith.constant dense<0.000000e+00> : vector<16x8xf32>
    %38 = tpu.matmul %37, %2, %cst_25 {dimension_numbers = #tpu.dot_dimension_numbers<[1], [0], [0], [1], [0, 0, 1, 1], [], []>, precision = #tpu.contract_precision<fp32>} : vector<16x32xf32>, vector<32x8xf32>, vector<16x8xf32> -> vector<16x8xf32>
    %cst_26 = arith.constant 1.000000e+00 : f32
    %39 = vector.broadcast %cst_26 : f32 to vector<16x1xf32>
    %40 = arith.divf %39, %27 : vector<16x1xf32>
    %cst_27 = arith.constant dense<0.000000e+00> : vector<16x8xf32>
    %41 = tpu.matmul %38, %3, %cst_27 {dimension_numbers = #tpu.dot_dimension_numbers<[1], [0], [0], [1], [0, 0, 1, 1], [], []>, precision = #tpu.contract_precision<fp32>} : vector<16x8xf32>, vector<8x8xf32>, vector<16x8xf32> -> vector<16x8xf32>
    %42 = vector.broadcast %40 : vector<16x1xf32> to vector<16x8xf32>
    %43 = vector.broadcast %4 : vector<1x8xf32> to vector<16x8xf32>
    %44 = arith.mulf %42, %43 : vector<16x8xf32>
    %45 = arith.addf %41, %44 : vector<16x8xf32>
    %46 = vector.broadcast %5 : vector<1x8xf32> to vector<16x8xf32>
    %47 = arith.addf %45, %46 : vector<16x8xf32>
    %cst_28 = arith.constant 0.000000e+00 : f32
    %48 = vector.broadcast %cst_28 : f32 to vector<16x8xf32>
    %49 = arith.cmpf ogt, %47, %48 : vector<16x8xf32>
    %cst_29 = arith.constant 2.000000e-01 : f32
    %50 = vector.broadcast %cst_29 : f32 to vector<16x8xf32>
    %51 = arith.mulf %50, %47 : vector<16x8xf32>
    %52 = arith.select %49, %47, %51 : vector<16x8xi1>, vector<16x8xf32>
    %c0_30 = arith.constant 0 : index
    %c0_31 = arith.constant 0 : index
    %c0_32 = arith.constant 0 : index
    %53 = vector.load %arg11[%c0_30, %c0_31, %c0_32] : memref<4x16x8xf32, #tpu.memory_space<vmem>>, vector<1x16x8xf32>
    %54 = vector.shape_cast %53 : vector<1x16x8xf32> to vector<16x8xf32>
    %55 = vector.shape_cast %52 : vector<16x8xf32> to vector<1x16x8xf32>
    tpu.vector_store %arg11[%c0_30, %c0_31, %c0_32], %55 {strides = array<i32>} : memref<4x16x8xf32, #tpu.memory_space<vmem>>, vector<1x16x8xf32>,
    %cst_33 = arith.constant 5.000000e-01 : f32
    %56 = vector.broadcast %cst_33 : f32 to vector<16x32xf32>
    %57 = arith.cmpf ogt, %37, %56 : vector<16x32xf32>
    %cst_34 = arith.constant 1.000000e+30 : f32
    %58 = vector.broadcast %cst_34 : f32 to vector<16x32xf32>
    %59 = arith.select %57, %58, %23 : vector<16x32xi1>, vector<16x32xf32>
    %cst_35 = arith.constant dense<0x7F800000> : vector<16xf32>
    %60 = vector.multi_reduction <minimumf>, %59, %cst_35 [1] : vector<16x32xf32> to vector<16xf32>
    %61 = vector.shape_cast %60 : vector<16xf32> to vector<16x1xf32>
    %62 = vector.broadcast %61 : vector<16x1xf32> to vector<16x32xf32>
    %63 = arith.cmpf oeq, %59, %62 : vector<16x32xf32>
    %cst_36 = arith.constant 3.200000e+01 : f32
    %64 = vector.broadcast %cst_36 : f32 to vector<16x32xf32>
    %65 = arith.select %63, %25, %64 : vector<16x32xi1>, vector<16x32xf32>
    %cst_37 = arith.constant dense<0x7F800000> : vector<16xf32>
    %66 = vector.multi_reduction <minimumf>, %65, %cst_37 [1] : vector<16x32xf32> to vector<16xf32>
    %67 = vector.shape_cast %66 : vector<16xf32> to vector<16x1xf32>
    %68 = vector.broadcast %67 : vector<16x1xf32> to vector<16x32xf32>
    %69 = arith.cmpf oeq, %25, %68 : vector<16x32xf32>
    %70 = arith.extui %69 : vector<16x32xi1> to vector<16x32xi32>
    %71 = arith.sitofp %70 : vector<16x32xi32> to vector<16x32xf32>
    %cst_38 = arith.constant dense<0.000000e+00> : vector<16x8xf32>
    %72 = tpu.matmul %71, %2, %cst_38 {dimension_numbers = #tpu.dot_dimension_numbers<[1], [0], [0], [1], [0, 0, 1, 1], [], []>, precision = #tpu.contract_precision<fp32>} : vector<16x32xf32>, vector<32x8xf32>, vector<16x8xf32> -> vector<16x8xf32>
    %cst_39 = arith.constant 1.000000e+00 : f32
    %73 = vector.broadcast %cst_39 : f32 to vector<16x1xf32>
    %74 = arith.divf %73, %61 : vector<16x1xf32>
    %cst_40 = arith.constant dense<0.000000e+00> : vector<16x8xf32>
    %75 = tpu.matmul %72, %3, %cst_40 {dimension_numbers = #tpu.dot_dimension_numbers<[1], [0], [0], [1], [0, 0, 1, 1], [], []>, precision = #tpu.contract_precision<fp32>} : vector<16x8xf32>, vector<8x8xf32>, vector<16x8xf32> -> vector<16x8xf32>
    %76 = vector.broadcast %74 : vector<16x1xf32> to vector<16x8xf32>
    %77 = vector.broadcast %4 : vector<1x8xf32> to vector<16x8xf32>
    %78 = arith.mulf %76, %77 : vector<16x8xf32>
    %79 = arith.addf %75, %78 : vector<16x8xf32>
    %80 = vector.broadcast %5 : vector<1x8xf32> to vector<16x8xf32>
    %81 = arith.addf %79, %80 : vector<16x8xf32>
    %cst_41 = arith.constant 0.000000e+00 : f32
    %82 = vector.broadcast %cst_41 : f32 to vector<16x8xf32>
    %83 = arith.cmpf ogt, %81, %82 : vector<16x8xf32>
    %cst_42 = arith.constant 2.000000e-01 : f32
    %84 = vector.broadcast %cst_42 : f32 to vector<16x8xf32>
    %85 = arith.mulf %84, %81 : vector<16x8xf32>
    %86 = arith.select %83, %81, %85 : vector<16x8xi1>, vector<16x8xf32>
    %c1 = arith.constant 1 : index
    %c0_43 = arith.constant 0 : index
    %c0_44 = arith.constant 0 : index
    %87 = vector.load %arg11[%c1, %c0_43, %c0_44] : memref<4x16x8xf32, #tpu.memory_space<vmem>>, vector<1x16x8xf32>
    %88 = vector.shape_cast %87 : vector<1x16x8xf32> to vector<16x8xf32>
    %89 = vector.shape_cast %86 : vector<16x8xf32> to vector<1x16x8xf32>
    tpu.vector_store %arg11[%c1, %c0_43, %c0_44], %89 {strides = array<i32>} : memref<4x16x8xf32, #tpu.memory_space<vmem>>, vector<1x16x8xf32>,
    %cst_45 = arith.constant 5.000000e-01 : f32
    %90 = vector.broadcast %cst_45 : f32 to vector<16x32xf32>
    %91 = arith.cmpf ogt, %71, %90 : vector<16x32xf32>
    %cst_46 = arith.constant 1.000000e+30 : f32
    %92 = vector.broadcast %cst_46 : f32 to vector<16x32xf32>
    %93 = arith.select %91, %92, %59 : vector<16x32xi1>, vector<16x32xf32>
    %cst_47 = arith.constant dense<0x7F800000> : vector<16xf32>
    %94 = vector.multi_reduction <minimumf>, %93, %cst_47 [1] : vector<16x32xf32> to vector<16xf32>
    %95 = vector.shape_cast %94 : vector<16xf32> to vector<16x1xf32>
    %96 = vector.broadcast %95 : vector<16x1xf32> to vector<16x32xf32>
    %97 = arith.cmpf oeq, %93, %96 : vector<16x32xf32>
    %cst_48 = arith.constant 3.200000e+01 : f32
    %98 = vector.broadcast %cst_48 : f32 to vector<16x32xf32>
    %99 = arith.select %97, %25, %98 : vector<16x32xi1>, vector<16x32xf32>
    %cst_49 = arith.constant dense<0x7F800000> : vector<16xf32>
    %100 = vector.multi_reduction <minimumf>, %99, %cst_49 [1] : vector<16x32xf32> to vector<16xf32>
    %101 = vector.shape_cast %100 : vector<16xf32> to vector<16x1xf32>
    %102 = vector.broadcast %101 : vector<16x1xf32> to vector<16x32xf32>
    %103 = arith.cmpf oeq, %25, %102 : vector<16x32xf32>
    %104 = arith.extui %103 : vector<16x32xi1> to vector<16x32xi32>
    %105 = arith.sitofp %104 : vector<16x32xi32> to vector<16x32xf32>
    %cst_50 = arith.constant dense<0.000000e+00> : vector<16x8xf32>
    %106 = tpu.matmul %105, %2, %cst_50 {dimension_numbers = #tpu.dot_dimension_numbers<[1], [0], [0], [1], [0, 0, 1, 1], [], []>, precision = #tpu.contract_precision<fp32>} : vector<16x32xf32>, vector<32x8xf32>, vector<16x8xf32> -> vector<16x8xf32>
    %cst_51 = arith.constant 1.000000e+00 : f32
    %107 = vector.broadcast %cst_51 : f32 to vector<16x1xf32>
    %108 = arith.divf %107, %95 : vector<16x1xf32>
    %cst_52 = arith.constant dense<0.000000e+00> : vector<16x8xf32>
    %109 = tpu.matmul %106, %3, %cst_52 {dimension_numbers = #tpu.dot_dimension_numbers<[1], [0], [0], [1], [0, 0, 1, 1], [], []>, precision = #tpu.contract_precision<fp32>} : vector<16x8xf32>, vector<8x8xf32>, vector<16x8xf32> -> vector<16x8xf32>
    %110 = vector.broadcast %108 : vector<16x1xf32> to vector<16x8xf32>
    %111 = vector.broadcast %4 : vector<1x8xf32> to vector<16x8xf32>
    %112 = arith.mulf %110, %111 : vector<16x8xf32>
    %113 = arith.addf %109, %112 : vector<16x8xf32>
    %114 = vector.broadcast %5 : vector<1x8xf32> to vector<16x8xf32>
    %115 = arith.addf %113, %114 : vector<16x8xf32>
    %cst_53 = arith.constant 0.000000e+00 : f32
    %116 = vector.broadcast %cst_53 : f32 to vector<16x8xf32>
    %117 = arith.cmpf ogt, %115, %116 : vector<16x8xf32>
    %cst_54 = arith.constant 2.000000e-01 : f32
    %118 = vector.broadcast %cst_54 : f32 to vector<16x8xf32>
    %119 = arith.mulf %118, %115 : vector<16x8xf32>
    %120 = arith.select %117, %115, %119 : vector<16x8xi1>, vector<16x8xf32>
    %c2 = arith.constant 2 : index
    %c0_55 = arith.constant 0 : index
    %c0_56 = arith.constant 0 : index
    %121 = vector.load %arg11[%c2, %c0_55, %c0_56] : memref<4x16x8xf32, #tpu.memory_space<vmem>>, vector<1x16x8xf32>
    %122 = vector.shape_cast %121 : vector<1x16x8xf32> to vector<16x8xf32>
    %123 = vector.shape_cast %120 : vector<16x8xf32> to vector<1x16x8xf32>
    tpu.vector_store %arg11[%c2, %c0_55, %c0_56], %123 {strides = array<i32>} : memref<4x16x8xf32, #tpu.memory_space<vmem>>, vector<1x16x8xf32>,
    %cst_57 = arith.constant 5.000000e-01 : f32
    %124 = vector.broadcast %cst_57 : f32 to vector<16x32xf32>
    %125 = arith.cmpf ogt, %105, %124 : vector<16x32xf32>
    %cst_58 = arith.constant 1.000000e+30 : f32
    %126 = vector.broadcast %cst_58 : f32 to vector<16x32xf32>
    %127 = arith.select %125, %126, %93 : vector<16x32xi1>, vector<16x32xf32>
    %cst_59 = arith.constant dense<0x7F800000> : vector<16xf32>
    %128 = vector.multi_reduction <minimumf>, %127, %cst_59 [1] : vector<16x32xf32> to vector<16xf32>
    %129 = vector.shape_cast %128 : vector<16xf32> to vector<16x1xf32>
    %130 = vector.broadcast %129 : vector<16x1xf32> to vector<16x32xf32>
    %131 = arith.cmpf oeq, %127, %130 : vector<16x32xf32>
    %cst_60 = arith.constant 3.200000e+01 : f32
    %132 = vector.broadcast %cst_60 : f32 to vector<16x32xf32>
    %133 = arith.select %131, %25, %132 : vector<16x32xi1>, vector<16x32xf32>
    %cst_61 = arith.constant dense<0x7F800000> : vector<16xf32>
    %134 = vector.multi_reduction <minimumf>, %133, %cst_61 [1] : vector<16x32xf32> to vector<16xf32>
    %135 = vector.shape_cast %134 : vector<16xf32> to vector<16x1xf32>
    %136 = vector.broadcast %135 : vector<16x1xf32> to vector<16x32xf32>
    %137 = arith.cmpf oeq, %25, %136 : vector<16x32xf32>
    %138 = arith.extui %137 : vector<16x32xi1> to vector<16x32xi32>
    %139 = arith.sitofp %138 : vector<16x32xi32> to vector<16x32xf32>
    %cst_62 = arith.constant dense<0.000000e+00> : vector<16x8xf32>
    %140 = tpu.matmul %139, %2, %cst_62 {dimension_numbers = #tpu.dot_dimension_numbers<[1], [0], [0], [1], [0, 0, 1, 1], [], []>, precision = #tpu.contract_precision<fp32>} : vector<16x32xf32>, vector<32x8xf32>, vector<16x8xf32> -> vector<16x8xf32>
    %cst_63 = arith.constant 1.000000e+00 : f32
    %141 = vector.broadcast %cst_63 : f32 to vector<16x1xf32>
    %142 = arith.divf %141, %129 : vector<16x1xf32>
    %cst_64 = arith.constant dense<0.000000e+00> : vector<16x8xf32>
    %143 = tpu.matmul %140, %3, %cst_64 {dimension_numbers = #tpu.dot_dimension_numbers<[1], [0], [0], [1], [0, 0, 1, 1], [], []>, precision = #tpu.contract_precision<fp32>} : vector<16x8xf32>, vector<8x8xf32>, vector<16x8xf32> -> vector<16x8xf32>
    %144 = vector.broadcast %142 : vector<16x1xf32> to vector<16x8xf32>
    %145 = vector.broadcast %4 : vector<1x8xf32> to vector<16x8xf32>
    %146 = arith.mulf %144, %145 : vector<16x8xf32>
    %147 = arith.addf %143, %146 : vector<16x8xf32>
    %148 = vector.broadcast %5 : vector<1x8xf32> to vector<16x8xf32>
    %149 = arith.addf %147, %148 : vector<16x8xf32>
    %cst_65 = arith.constant 0.000000e+00 : f32
    %150 = vector.broadcast %cst_65 : f32 to vector<16x8xf32>
    %151 = arith.cmpf ogt, %149, %150 : vector<16x8xf32>
    %cst_66 = arith.constant 2.000000e-01 : f32
    %152 = vector.broadcast %cst_66 : f32 to vector<16x8xf32>
    %153 = arith.mulf %152, %149 : vector<16x8xf32>
    %154 = arith.select %151, %149, %153 : vector<16x8xi1>, vector<16x8xf32>
    %c3 = arith.constant 3 : index
    %c0_67 = arith.constant 0 : index
    %c0_68 = arith.constant 0 : index
    %155 = vector.load %arg11[%c3, %c0_67, %c0_68] : memref<4x16x8xf32, #tpu.memory_space<vmem>>, vector<1x16x8xf32>
    %156 = vector.shape_cast %155 : vector<1x16x8xf32> to vector<16x8xf32>
    %157 = vector.shape_cast %154 : vector<16x8xf32> to vector<1x16x8xf32>
    tpu.vector_store %arg11[%c3, %c0_67, %c0_68], %157 {strides = array<i32>} : memref<4x16x8xf32, #tpu.memory_space<vmem>>, vector<1x16x8xf32>,
    return
  }
  func.func @transform_0(%arg0: i32) -> (i32, i32) {
    %c0_i32 = arith.constant 0 : i32
    %c0_i32_0 = arith.constant 0 : i32
    return %arg0, %c0_i32 : i32, i32
  }
  func.func @transform_1(%arg0: i32) -> (i32, i32) {
    %c0_i32 = arith.constant 0 : i32
    %c0_i32_0 = arith.constant 0 : i32
    return %arg0, %c0_i32 : i32, i32
  }
  func.func @transform_2(%arg0: i32) -> (i32, i32) {
    %c0_i32 = arith.constant 0 : i32
    %c0_i32_0 = arith.constant 0 : i32
    return %arg0, %c0_i32 : i32, i32
  }
  func.func @transform_3(%arg0: i32) -> (i32, i32) {
    %c0_i32 = arith.constant 0 : i32
    %c0_i32_0 = arith.constant 0 : i32
    %c0_i32_1 = arith.constant 0 : i32
    return %c0_i32, %c0_i32_0 : i32, i32
  }
  func.func @transform_4(%arg0: i32) -> (i32, i32) {
    %c0_i32 = arith.constant 0 : i32
    %c0_i32_0 = arith.constant 0 : i32
    %c0_i32_1 = arith.constant 0 : i32
    return %c0_i32, %c0_i32_0 : i32, i32
  }
  func.func @transform_5(%arg0: i32) -> (i32, i32) {
    %c0_i32 = arith.constant 0 : i32
    %c0_i32_0 = arith.constant 0 : i32
    %c0_i32_1 = arith.constant 0 : i32
    return %c0_i32, %c0_i32_0 : i32, i32
  }
  func.func @transform_6(%arg0: i32) -> (i32, i32) {
    %c0_i32 = arith.constant 0 : i32
    %c0_i32_0 = arith.constant 0 : i32
    %c0_i32_1 = arith.constant 0 : i32
    return %c0_i32, %c0_i32_0 : i32, i32
  }
  func.func @transform_7(%arg0: i32) -> (i32, i32) {
    %c0_i32 = arith.constant 0 : i32
    %c0_i32_0 = arith.constant 0 : i32
    %c0_i32_1 = arith.constant 0 : i32
    return %c0_i32, %c0_i32_0 : i32, i32
  }
  func.func @transform_8(%arg0: i32) -> (i32, i32) {
    %c0_i32 = arith.constant 0 : i32
    %c0_i32_0 = arith.constant 0 : i32
    %c0_i32_1 = arith.constant 0 : i32
    return %c0_i32, %c0_i32_0 : i32, i32
  }
  func.func @transform_9(%arg0: i32) -> (i32, i32) {
    %c0_i32 = arith.constant 0 : i32
    %c0_i32_0 = arith.constant 0 : i32
    %c0_i32_1 = arith.constant 0 : i32
    return %c0_i32, %c0_i32_0 : i32, i32
  }
  func.func @transform_10(%arg0: i32) -> (i32, i32, i32) {
    %c0_i32 = arith.constant 0 : i32
    %c0_i32_0 = arith.constant 0 : i32
    %c0_i32_1 = arith.constant 0 : i32
    return %c0_i32, %arg0, %c0_i32_0 : i32, i32, i32
  }
}

</mosaic_0001>

<bundles_post_ra>
// kernel: tpu_custom_call.1
= control target key start
LH: loop header
LB: loop body
LE: loop exit
PB: predicated region body
PF: predicated region fallthrough
CT: control target
= control target key end

     0   :  { %vm48_vm0 = vcmask 23552   ;;  %v2303_v36 = vmov 0   ;;  %vm330_vm1 = vcmask 261120   ;;  %vm610_vm12 = vcmask 64512   ;;  %s2879_s3 = inlined_call_operand.vmem [shape: f32[32,3], index: 3, kind: input, shape index: {}]   ;;  %s2880_s0 = inlined_call_operand.vmem [shape: f32[16,3], index: 0, kind: input, shape index: {}]   ;;  %s2881_s1 = inlined_call_operand.vmem [shape: f32[16,1], index: 1, kind: input, shape index: {}]   ;;  %s2882_s2 = inlined_call_operand.vmem [shape: f32[16,1], index: 2, kind: input, shape index: {}]   ;;  %s2883_s4 = inlined_call_operand.vmem [shape: f32[1,32], index: 4, kind: input, shape index: {}]   ;;  %s2884_s5 = inlined_call_operand.vmem [shape: f32[1,32], index: 5, kind: input, shape index: {}]   ;;  %s2885_s8 = inlined_call_operand.vmem [shape: f32[1,8], index: 8, kind: input, shape index: {}]   ;;  %s2886_s6 = inlined_call_operand.vmem [shape: f32[32,8], index: 6, kind: input, shape index: {}]   ;;  %s2887_s7 = inlined_call_operand.vmem [shape: f32[8,8], index: 7, kind: input, shape index: {}]   ;;  %s2888_s9 = inlined_call_operand.vmem [shape: f32[1,8], index: 9, kind: input, shape index: {}]   ;;  %s2889_s10 = inlined_call_operand.vmem [shape: f32[4,16,8], index: 10, kind: output, shape index: {}]  }
   0x1   :  { %v40_v0 = vld [vmem:[%s2879_s3 + $0x18] sm:$0xff]  ;;  %v39_v1 = vld [vmem:[%s2879_s3 + $0x10] sm:$0xff]  ;;  %v38_v2 = vld [vmem:[%s2879_s3 + $0x8] sm:$0xff]  ;;  %2281 = vset.pattern.permute.xlu0 %v2303_v36  ;;  %2282 = vset.pattern.permute.xlu1 %v2303_v36 }
   0x2   :  { %v65_v3 = vsel %vm48_vm0, %v40_v0, 0  ;;  %v62_v4 = vsel %vm48_vm0, %v39_v1, 0  ;;  %v59_v5 = vsel %vm48_vm0, %v38_v2, 0  ;;  %v37_v6 = vld [vmem:[%s2879_s3] sm:$0xff]  ;;  %v36_v8 = vld [vmem:[%s2880_s0 + $0x8] sm:$0xff] }
   0x3   :  { %v35_v7 = vld [vmem:[%s2880_s0] sm:$0xff]  ;;  %v2381_v9 = vand.u32 4294901760, %v65_v3  ;;  %v2383_v10 = vand.u32 4294901760, %v62_v4  ;;  %v2385_v11 = vand.u32 4294901760, %v59_v5  ;;  %v56_v12 = vsel %vm48_vm0, %v37_v6, 0  ;;  %v284_v42 = vld [vmem:[%s2881_s1 + $0x8] sm:$0xff] }
   0x4   :  { %v2388_v13 = vand.u32 4294901760, %v56_v12  ;;  %v50_v14 = vsel %vm48_vm0, %v35_v7, 0  ;;  %v53_v15 = vsel %vm48_vm0, %v36_v8, 0  ;;  %v283_v32 = vld [vmem:[%s2881_s1] sm:$0xff]  ;;  %293 = vperm.xlu1 %2282, %v284_v42   ;;  %v308_v46 = vld [vmem:[%s2882_s2 + $0x8] sm:$0xff] }
   0x5   :  { %80 = vmatpush.xpose.msra.mxu0 %v2381_v9  ;;  %v117_v16 = vsub.f32 %v65_v3, %v2381_v9  ;;  %197 = vmatpush.xpose.msra.mxu3 %v2381_v9  ;;  %v123_v17 = vsub.f32 %v62_v4, %v2383_v10  ;;  %v129_v18 = vsub.f32 %v59_v5, %v2385_v11  ;;  %v2397_v19 = vand.u32 4294901760, %v50_v14  ;;  %v307_v44 = vld [vmem:[%s2882_s2] sm:$0xff] }
   0x6   :  { %v135_v23 = vsub.f32 %v56_v12, %v2388_v13  ;;  %v2401_v24 = vand.u32 4294901760, %v53_v15  ;;  %288 = vperm.xlu0 %2281, %v283_v32   ;;  %v2283_v62 = vld [vmem:[%s2883_s4] ss:$0 sm:$0xff]  ;;  %v327_v32 = vlaneseq }
   0x7   :  { %163 = vmatpush.xpose.msra.mxu2 %v117_v16  ;;  %v118_v20 = vand.u32 4294901760, %v117_v16  ;;  %v124_v21 = vand.u32 4294901760, %v123_v17  ;;  %v88_v22 = vsub.f32 %v50_v14, %v2397_v19  ;;  %v130_v28 = vand.u32 4294901760, %v129_v18 }
   0x8   :  { %v96_v31 = vsub.f32 %v53_v15, %v2401_v24  ;;  %v136_v35 = vand.u32 4294901760, %v135_v23 }
   0x9   :  { %82 = vmatpush.xpose.msra.mxu0 %v2383_v10  ;;  %v119_v25 = vsub.f32 %v117_v16, %v118_v20  ;;  %199 = vmatpush.xpose.msra.mxu3 %v2383_v10  ;;  %v125_v26 = vsub.f32 %v123_v17, %v124_v21  ;;  %v89_v27 = vand.u32 4294901760, %v88_v22  ;;  %v131_v34 = vsub.f32 %v129_v18, %v130_v28 }
   0xa   :  { %v97_v38 = vand.u32 4294901760, %v96_v31  ;;  %v137_v40 = vsub.f32 %v135_v23, %v136_v35 }
   0xb   :  { %166 = vmatpush.xpose.msra.mxu2 %v123_v17  ;;  %v120_v29 = vand.u32 4294901760, %v119_v25  ;;  %v90_v30 = vsub.f32 %v88_v22, %v89_v27  ;;  %v126_v33 = vand.u32 4294901760, %v125_v26  ;;  %v132_v39 = vand.u32 4294901760, %v131_v34  ;;  %v42_v25 = vld [vmem:[%s2886_s6 + $0x8] sm:$0xff] }
   0xc   :  { %v98_v41 = vsub.f32 %v96_v31, %v97_v38  ;;  %v138_v43 = vand.u32 4294901760, %v137_v40  ;;  %317 = vperm.xlu1 %2282, %v308_v46  }
   0xd   :  { %84 = vmatpush.xpose.msra.mxu0 %v2385_v11  ;;  %121 = vmatpush.xpose.msra.mxu1 %v120_v29  ;;  %v91_v37 = vand.u32 4294901760, %v90_v30 }
   0xe   :  { %201 = vmatpush.xpose.msra.mxu3 %v2385_v11  ;;  %v99_v45 = vand.u32 4294901760, %v98_v41  ;;  %312 = vperm.xlu0 %2281, %v307_v44  }
   0xf   :  { %169 = vmatpush.xpose.msra.mxu2 %v129_v18 }
  0x11   :  { %86 = vmatpush.xpose.msra.mxu0 %v2388_v13  ;;  %127 = vmatpush.xpose.msra.mxu1 %v126_v33 }
  0x12   :  { %203 = vmatpush.xpose.msra.mxu3 %v2388_v13 }
  0x13   :  { %172 = vmatpush.xpose.msra.mxu2 %v135_v23  ;;  %v44_v23 = vld [vmem:[%s2886_s6 + $0x18] sm:$0xff] }
  0x14   :  { %92 = vmatmul.f32.vlgmr.msra.gmra.mxu0 %v91_v37  ;;  %v2459_v26 = vand.u32 4294901760, %v44_v23 }
  0x15   :  { %232 = vmatpush.xpose.msrb.mxu0 %v118_v20  ;;  %133 = vmatpush.xpose.msra.mxu1 %v132_v39  ;;  %v328_v39 = vand.u32 127, %v327_v32 }
  0x16   :  { %2275 = vmatpush.xpose.msrb.mxu3 %v2381_v9  ;;  %175 = vmatmul.f32.vlgmr.msra.gmra.mxu2 %v88_v22  ;;  %v2466_v29 = vsub.f32 %v44_v23, %v2459_v26 }
  0x17   :  { %2271 = vmatpush.xpose.msrb.mxu2 %v118_v20  ;;  %207 = vmatmul.f32.vlgmr.msra.gmra.mxu3 %v89_v27 }
  0x18   :  { %v2477_v33 = vand.u32 4294901760, %v2466_v29 }
  0x19   :  { %236 = vmatpush.xpose.msrb.mxu0 %v124_v21  ;;  %139 = vmatpush.xpose.msra.mxu1 %v138_v43  ;;  %v2505_v43 = vcvt.s32.f32 %v328_v39 }
  0x1a   :  { %2276 = vmatpush.xpose.msrb.mxu3 %v2383_v10  ;;  %v411_v36 = vsub.f32 %v2466_v29, %v2477_v33 }
  0x1b   :  { %2272 = vmatpush.xpose.msrb.mxu2 %v124_v21 }
  0x1c   :  { %100 = vmatmul.f32.gmra.mxu0 %v99_v45  ;;  %141 = vmatmul.f32.vlgmr.msra.gmra.mxu1 %v2397_v19  ;;  %v2497_v40 = vand.u32 4294901760, %v411_v36 }
  0x1d   :  { %267 = vmatpush.xpose.msrb.mxu1 %v2381_v9  ;;  %240 = vmatpush.xpose.msrb.mxu0 %v130_v28 }
  0x1e   :  { %2277 = vmatpush.xpose.msrb.mxu3 %v2385_v11  ;;  %180 = vmatmul.f32.gmra.mxu2 %v96_v31 }
  0x1f   :  { %2273 = vmatpush.xpose.msrb.mxu2 %v130_v28  ;;  %213 = vmatmul.f32.gmra.mxu3 %v97_v38  ;;  %v2463_v28 = vand.u32 4294901760, %v42_v25 }
  0x21   :  { %269 = vmatpush.xpose.msrb.mxu1 %v2383_v10  ;;  %244 = vmatpush.xpose.msrb.mxu0 %v136_v35  ;;  %v2284_v10 = vld [vmem:[%s2884_s5] ss:$0 sm:$0xff]  ;;  %v2472_v31 = vsub.f32 %v42_v25, %v2463_v28 }
  0x22   :  { %2278 = vmatpush.xpose.msrb.mxu3 %v2388_v13 }
  0x23   :  { %2274 = vmatpush.xpose.msrb.mxu2 %v136_v35  ;;  %v2484_v35 = vand.u32 4294901760, %v2472_v31 }
  0x24   :  { %145 = vmatmul.f32.gmra.mxu1 %v2401_v24  ;;  %246 = vmatmul.f32.vlgmr.msrb.gmra.mxu0 %v2397_v19 }
  0x25   :  { %271 = vmatpush.xpose.msrb.mxu1 %v2385_v11  ;;  %455 = vmatpush.msra.mxu0 %v2466_v29  ;;  %v423_v38 = vsub.f32 %v2472_v31, %v2484_v35 }
  0x26   :  { %250 = vmatmul.f32.vlgmr.msrb.gmra.mxu2 %v2401_v24  ;;  %413 = vmatpush.msra.mxu3 %v2497_v40 }
  0x27   :  { %279 = vmatmul.f32.vlgmr.msrb.gmra.mxu3 %v2401_v24  ;;  %v43_v24 = vld [vmem:[%s2886_s6 + $0x10] sm:$0xff]  ;;  %372 = vmatpush.msra.mxu2 %v2459_v26  ;;  %v2503_v42 = vand.u32 4294901760, %v423_v38 }
  0x28   :  { %v2461_v27 = vand.u32 4294901760, %v43_v24 }
  0x29   :  { %273 = vmatpush.xpose.msrb.mxu1 %v2388_v13 }
  0x2a   :  { %v2469_v30 = vsub.f32 %v43_v24, %v2461_v27  ;;  %374 = vmatpush.msra.mxu2 %v2461_v27 }
  0x2c   :  { %275 = vmatmul.f32.vlgmr.msrb.gmra.mxu1 %v2397_v19  ;;  %v2480_v34 = vand.u32 4294901760, %v2469_v30  ;;  %458 = vmatpush.msra.mxu0 %v2469_v30 }
  0x2d   :  { %489 = vmatpush.msra.mxu1 %v2459_v26  ;;  %376 = vmatpush.msra.mxu2 %v2463_v28 }
  0x2e   :  { %v417_v37 = vsub.f32 %v2469_v30, %v2480_v34  ;;  %461 = vmatpush.msra.mxu0 %v2472_v31 }
  0x2f   :  { %491 = vmatpush.msra.mxu1 %v2461_v27 }
  0x30   :  { %v2499_v41 = vand.u32 4294901760, %v417_v37 }
  0x31   :  { %493 = vmatpush.msra.mxu1 %v2463_v28 }
  0x32   :  { %419 = vmatpush.msra.mxu3 %v2499_v41 }
  0x34   :  { %425 = vmatpush.msra.mxu3 %v2503_v42 }
  0x76   :  { %v294_v1 = vpop.permute.xlu1 %293 }
  0x77   :  { %v300_v9 = vadd.f32 %v2283_v62, %v294_v1 }
  0x78   :  { %v289_v58 = vpop.permute.xlu0 %288 }
  0x79   :  { %v299_v7 = vadd.f32 %v2283_v62, %v289_v58 }
  0x7e   :  { %v318_v19 = vpop.permute.xlu1 %317 }
  0x7f   :  { %vm324_vm3 = vcmp.eq.f32.partialorder %v318_v19, %v2284_v10 }
  0x80   :  { %v313_v12 = vpop.permute.xlu0 %312 }
  0x81   :  { %vm323_vm2 = vcmp.eq.f32.partialorder %v313_v12, %v2284_v10 }
  0x91   :  { %v93_v47 = vpop.f32.mrf.mxu0 }
  0x99   :  { %v142_v49 = vpop.f32.mrf.mxu1  ;;  %v176_v50 = vpop.f32.mrf.mxu2 }
  0x9a   :  { %v208_v48 = vpop.f32.mrf.mxu3  ;;  %v101_v51 = vpop.f32.mrf.mxu0  ;;  %v143_v52 = vadd.f32 %v142_v49, %v93_v47 }
  0x9c   :  { %v177_v55 = vadd.f32 %v176_v50, %v143_v52  ;;  %v41_v50 = vld [vmem:[%s2886_s6] sm:$0xff] }
  0x9e   :  { %v209_v61 = vadd.f32 %v208_v48, %v177_v55 }
  0xa1   :  { %v146_v54 = vpop.f32.mrf.mxu1  ;;  %v181_v57 = vpop.f32.mrf.mxu2 }
  0xa2   :  { %v214_v53 = vpop.f32.mrf.mxu3  ;;  %v147_v56 = vadd.f32 %v146_v54, %v101_v51  ;;  %v247_v60 = vpop.f32.mrf.mxu0  ;;  %v2524_v51 = vand.u32 4294901760, %v41_v50 }
  0xa3   :  { %v248_v63 = vadd.f32 %v247_v60, %v209_v61 }
  0xa4   :  { %v182_v59 = vadd.f32 %v181_v57, %v147_v56  ;;  %v2527_v52 = vsub.f32 %v41_v50, %v2524_v51  ;;  %495 = vmatpush.msra.mxu1 %v2524_v51  ;;  %378 = vmatpush.msra.mxu2 %v2524_v51  ;;  %v2304_v57 = vmov 0.0  }
  0xa6   :  { %v215_v0 = vadd.f32 %v214_v53, %v182_v59  ;;  %524 = vmatpush.msrb.mxu2 %v2477_v33  ;;  %v2533_v53 = vand.u32 4294901760, %v2527_v52  ;;  %464 = vmatpush.msra.mxu0 %v2527_v52 }
  0xa8   :  { %528 = vmatpush.msrb.mxu2 %v2480_v34  ;;  %v429_v54 = vsub.f32 %v2527_v52, %v2533_v53 }
  0xa9   :  { %v276_v2 = vpop.f32.mrf.mxu1  ;;  %v251_v3 = vpop.f32.mrf.mxu2 }
  0xaa   :  { %v277_v4 = vadd.f32 %v276_v2, %v248_v63  ;;  %v280_v5 = vpop.f32.mrf.mxu3  ;;  %v252_v6 = vadd.f32 %v251_v3, %v215_v0  ;;  %532 = vmatpush.msrb.mxu2 %v2484_v35  ;;  %v2540_v55 = vand.u32 4294901760, %v429_v54 }
  0xac   :  { %v301_v8 = vmul.f32 2.0, %v277_v4  ;;  %v281_v11 = vadd.f32 %v280_v5, %v252_v6  ;;  %536 = vmatpush.msrb.mxu2 %v2533_v53  ;;  %431 = vmatpush.msra.mxu3 %v2540_v55 }
  0xae   :  { %v303_v13 = vsub.f32 %v299_v7, %v301_v8  ;;  %v302_v14 = vmul.f32 2.0, %v281_v11  ;;  %559 = vmatpush.msrb.mxu3 %v2459_v26 }
  0xb0   :  { %v305_v15 = vmax.f32 %v303_v13, 0.0  ;;  %v304_v16 = vsub.f32 %v300_v9, %v302_v14  ;;  %561 = vmatpush.msrb.mxu3 %v2461_v27  ;;  %v45_v14 = vld [vmem:[%s2887_s7] sm:$0xff] }
  0xb2   :  { %v2442_v17 = vsel %vm323_vm2, %v305_v15, 1e+30  ;;  %v306_v20 = vmax.f32 %v304_v16, 0.0  ;;  %563 = vmatpush.msrb.mxu3 %v2463_v28  ;;  %v2579_v15 = vand.u32 4294901760, %v45_v14 }
  0xb3   :  { %v331_v18 = vsel %vm330_vm1, %v2442_v17, inf }
  0xb4   :  { %332 = vmin.xlane.f32.xlu2 %v331_v18  ;;  %v2446_v21 = vsel %vm324_vm3, %v306_v20, 1e+30  ;;  %565 = vmatpush.msrb.mxu3 %v2524_v51  ;;  %v2582_v16 = vsub.f32 %v45_v14, %v2579_v15 }
  0xb5   :  { %v334_v22 = vsel %vm330_vm1, %v2446_v21, inf  ;;  %633 = vmatpush.msrb.mxu0 %v2579_v15 }
  0xb6   :  { %v2590_v18 = vand.u32 4294901760, %v2582_v16 }
  0xb8   :  { %v669_v20 = vsub.f32 %v2582_v16, %v2590_v18 }
  0xbc   :  { %335 = vmin.xlane.f32.xlu2 %v334_v22  ;;  %v2604_v22 = vand.u32 4294901760, %v669_v20 }
  0xbe   :  { %671 = vmatpush.msrb.mxu1 %v2604_v22 }
 0x127   :  { %v2508_v44 = vpop.xlane.xlu2 %332 }
 0x128   :  { %vm337_vm4 = vcmp.eq.f32.partialorder %v2442_v17, %v2508_v44  ;;  %2287 = vrcp.f32 %v2508_v44  ;;  %vm580_vm3 = vweird.f32 %v2508_v44 }
 0x129   :  { %v339_v45 = vsel %vm337_vm4, %v2505_v43, 32.0 }
 0x12a   :  { %v341_v46 = vsel %vm330_vm1, %v339_v45, inf }
 0x12b   :  { %342 = vmin.xlane.f32.xlu0 %v341_v46 }
 0x12f   :  { %v2515_v47 = vpop.xlane.xlu2 %335 }
 0x130   :  { %vm338_vm5 = vcmp.eq.f32.partialorder %v2446_v21, %v2515_v47  ;;  %2289 = vrcp.f32 %v2515_v47 }
 0x131   :  { %v340_v48 = vsel %vm338_vm5, %v2505_v43, 32.0 }
 0x132   :  { %v344_v49 = vsel %vm330_vm1, %v340_v48, inf }
 0x133   :  { %345 = vmin.xlane.f32.xlu1 %v344_v49 }
 0x19e   :  { %v343_v56 = vpop.xlane.xlu0 %342 }
 0x19f   :  { %vm347_vm6 = vcmp.eq.f32.partialorder %v2505_v43, %v343_v56 }
 0x1a0   :  { %v2233_v58 = vsel %vm347_vm6, 1.0, %v2304_v57 }
 0x1a1   :  { %2235 = vmatmul.msk.f32.vlgmr.msra.gmra.mxu3 %vm330_vm1, %v2233_v58  ;;  %v354_v59 = vsel %vm330_vm1, %v2233_v58, 0  ;;  %vm807_vm7 = vcmp.gt.f32.partialorder %v2233_v58, 0.5 }
 0x1a2   :  { %v380_v60 = vsub.f32 %v354_v59, %v354_v59  ;;  %v2553_v61 = vsel %vm807_vm7, 1e+30, %v2442_v17  ;;  %726 = vmatpush.msra.mxu3 %v2579_v15  ;;  %vm595_vm7 = vweird.f32 %v2515_v47 }
 0x1a3   :  { %v811_v62 = vsel %vm330_vm1, %v2553_v61, inf }
 0x1a4   :  { %467 = vmatmul.f32.vlgmr.msra.gmra.mxu0 %v380_v60  ;;  %812 = vmin.xlane.f32.xlu2 %v811_v62  ;;  %v381_v63 = vand.u32 4294901760, %v380_v60 }
 0x1a5   :  { %758 = vmatpush.msra.mxu0 %v2590_v18 }
 0x1a6   :  { %499 = vmatmul.f32.vlgmr.msra.gmra.mxu1 %v381_v63  ;;  %v346_v0 = vpop.xlane.xlu1 %345  ;;  %v382_v1 = vsub.f32 %v380_v60, %v381_v63 }
 0x1a7   :  { %vm348_vm8 = vcmp.eq.f32.partialorder %v2505_v43, %v346_v0  ;;  %784 = vmatpush.msra.mxu1 %v2579_v15 }
 0x1a8   :  { %v2234_v2 = vsel %vm348_vm8, 1.0, %v2304_v57  ;;  %v383_v3 = vand.u32 4294901760, %v382_v1 }
 0x1a9   :  { %2236 = vmatmul.msk.f32.gmra.mxu3 %vm330_vm1, %v2234_v2  ;;  %vm808_vm9 = vcmp.gt.f32.partialorder %v2234_v2, 0.5  ;;  %v357_v4 = vsel %vm330_vm1, %v2234_v2, 0 }
 0x1aa   :  { %384 = vmatmul.f32.vlgmr.msra.gmra.mxu2 %v383_v3  ;;  %v2562_v5 = vsel %vm808_vm9, 1e+30, %v2446_v21  ;;  %v388_v6 = vsub.f32 %v357_v4, %v357_v4 }
 0x1ab   :  { %v814_v7 = vsel %vm330_vm1, %v2562_v5, inf  ;;  %698 = vmatpush.msra.mxu2 %v2582_v16 }
 0x1ac   :  { %815 = vmin.xlane.f32.xlu2 %v814_v7  ;;  %472 = vmatmul.f32.gmra.mxu0 %v388_v6  ;;  %v389_v8 = vand.u32 4294901760, %v388_v6 }
 0x1ae   :  { %505 = vmatmul.f32.gmra.mxu1 %v389_v8  ;;  %v390_v9 = vsub.f32 %v388_v6, %v389_v8 }
 0x1b0   :  { %v391_v10 = vand.u32 4294901760, %v390_v9 }
 0x1b1   :  { %2239 = vmatmul.msk.f32.vlgmr.msrb.gmra.mxu3 %vm330_vm1, %v2233_v58 }
 0x1b2   :  { %392 = vmatmul.f32.gmra.mxu2 %v391_v10  ;;  %893 = vmatpush.msrb.mxu3 %v2497_v40 }
 0x1b4   :  { %899 = vmatpush.msrb.mxu3 %v2499_v41 }
 0x1b6   :  { %905 = vmatpush.msrb.mxu3 %v2503_v42 }
 0x1b8   :  { %911 = vmatpush.msrb.mxu3 %v2540_v55 }
 0x1b9   :  { %2240 = vmatmul.msk.f32.gmra.mxu3 %vm330_vm1, %v2234_v2 }
 0x1ba   :  { %2237 = vmatmul.msk.f32.vlgmr.msrb.gmra.mxu2 %vm330_vm1, %v2233_v58 }
 0x1bb   :  { %852 = vmatpush.msrb.mxu2 %v2459_v26 }
 0x1bd   :  { %854 = vmatpush.msrb.mxu2 %v2461_v27 }
 0x1bf   :  { %856 = vmatpush.msrb.mxu2 %v2463_v28 }
 0x1c1   :  { %858 = vmatpush.msrb.mxu2 %v2524_v51 }
 0x1c2   :  { %2238 = vmatmul.msk.f32.gmra.mxu2 %vm330_vm1, %v2234_v2 }
 0x217   :  { %v2570_v11 = vpop.xlane.xlu2 %812 }
 0x218   :  { %vm817_vm10 = vcmp.eq.f32.partialorder %v2553_v61, %v2570_v11  ;;  %2291 = vrcp.f32 %v2570_v11 }
 0x219   :  { %v819_v12 = vsel %vm817_vm10, %v2505_v43, 32.0 }
 0x21a   :  { %v821_v13 = vsel %vm330_vm1, %v819_v12, inf }
 0x21b   :  { %822 = vmin.xlane.f32.xlu2 %v821_v13 }
 0x21f   :  { %v2587_v17 = vpop.xlane.xlu2 %815 }
 0x220   :  { %vm818_vm11 = vcmp.eq.f32.partialorder %v2562_v5, %v2587_v17  ;;  %2293 = vrcp.f32 %v2587_v17 }
 0x221   :  { %v820_v19 = vsel %vm818_vm11, %v2505_v43, 32.0  ;;  %v468_v36 = vpop.f32.mrf.mxu0 }
 0x222   :  { %v824_v21 = vsel %vm330_vm1, %v820_v19, inf }
 0x223   :  { %825 = vmin.xlane.f32.xlu2 %v824_v21  ;;  %v500_v39 = vpop.f32.mrf.mxu1 }
 0x224   :  { %v434_v23 = vpop.f32.mrf.mxu3 }
 0x229   :  { %v473_v54 = vpop.f32.mrf.mxu0 }
 0x22b   :  { %v506_v60 = vpop.f32.mrf.mxu1 }
 0x22c   :  { %v438_v25 = vpop.f32.mrf.mxu3 }
 0x22d   :  { %v385_v24 = vpop.f32.mrf.mxu2 }
 0x22e   :  { %v435_v32 = vadd.f32 %v434_v23, %v385_v24 }
 0x230   :  { %v469_v38 = vadd.f32 %v468_v36, %v435_v32 }
 0x232   :  { %v501_v46 = vadd.f32 %v500_v39, %v469_v38 }
 0x234   :  { %v568_v48 = vpop.f32.mrf.mxu3 }
 0x235   :  { %v393_v37 = vpop.f32.mrf.mxu2 }
 0x236   :  { %v439_v45 = vadd.f32 %v438_v25, %v393_v37 }
 0x238   :  { %v474_v56 = vadd.f32 %v473_v54, %v439_v45 }
 0x23a   :  { %v507_v63 = vadd.f32 %v506_v60, %v474_v56 }
 0x23c   :  { %v572_v3 = vpop.f32.mrf.mxu3 }
 0x23d   :  { %v539_v49 = vpop.f32.mrf.mxu2 }
 0x23e   :  { %v540_v50 = vadd.f32 %v539_v49, %v501_v46 }
 0x240   :  { %v569_v58 = vadd.f32 %v568_v48, %v540_v50 }
 0x242   :  { %v612_v59 = vsel %vm610_vm12, %v569_v58, 0 }
 0x243   :  { %v634_v62 = vand.u32 4294901760, %v612_v59 }
 0x245   :  { %v635_v0 = vsub.f32 %v612_v59, %v634_v62  ;;  %v543_v1 = vpop.f32.mrf.mxu2  ;;  %673 = vmatmul.f32.vlgmr.msrb.gmra.mxu1 %v634_v62 }
 0x246   :  { %v544_v2 = vadd.f32 %v543_v1, %v507_v63  ;;  %969 = vmatpush.msrb.mxu1 %v2459_v26 }
 0x247   :  { %701 = vmatmul.f32.vlgmr.msra.gmra.mxu2 %v635_v0  ;;  %v636_v4 = vand.u32 4294901760, %v635_v0 }
 0x248   :  { %v573_v6 = vadd.f32 %v572_v3, %v544_v2  ;;  %971 = vmatpush.msrb.mxu1 %v2461_v27  ;;  %1004 = vmatpush.msra.mxu2 %v2477_v33  ;;  %v586_v2 = vand.u32 2147483648, %v2508_v44  ;;  %v584_v3 = vand.u32 2147483647, %v2508_v44 }
 0x249   :  { %730 = vmatmul.f32.vlgmr.msra.gmra.mxu3 %v636_v4  ;;  %v637_v7 = vsub.f32 %v635_v0, %v636_v4 }
 0x24a   :  { %v615_v8 = vsel %vm610_vm12, %v573_v6, 0  ;;  %973 = vmatpush.msrb.mxu1 %v2463_v28  ;;  %1039 = vmatpush.msra.mxu3 %v2459_v26  ;;  %vm585_vm5 = vcmp.eq.f32.partialorder %v584_v3, 8.507059e+37 }
 0x24b   :  { %v642_v9 = vand.u32 4294901760, %v615_v8  ;;  %v638_v10 = vand.u32 4294901760, %v637_v7  ;;  %1008 = vmatpush.msra.mxu2 %v2480_v34 }
 0x24c   :  { %975 = vmatpush.msrb.mxu1 %v2524_v51  ;;  %1041 = vmatpush.msra.mxu3 %v2461_v27 }
 0x24d   :  { %639 = vmatmul.f32.vlgmr.msrb.gmra.mxu0 %v638_v10  ;;  %677 = vmatmul.f32.gmra.mxu1 %v642_v9  ;;  %v643_v12 = vsub.f32 %v615_v8, %v642_v9  ;;  %v587_v8 = vor.u32 1.1754944e-38, %v586_v2 }
 0x24e   :  { %935 = vmatpush.msrb.mxu0 %v2466_v29  ;;  %1043 = vmatpush.msra.mxu3 %v2463_v28 }
 0x24f   :  { %706 = vmatmul.f32.gmra.mxu2 %v643_v12  ;;  %v644_v13 = vand.u32 4294901760, %v643_v12 }
 0x250   :  { %938 = vmatpush.msrb.mxu0 %v2469_v30  ;;  %1045 = vmatpush.msra.mxu3 %v2524_v51 }
 0x251   :  { %736 = vmatmul.f32.gmra.mxu3 %v644_v13  ;;  %v645_v14 = vsub.f32 %v643_v12, %v644_v13  ;;  %1012 = vmatpush.msra.mxu2 %v2484_v35 }
 0x252   :  { %941 = vmatpush.msrb.mxu0 %v2472_v31 }
 0x253   :  { %v646_v19 = vand.u32 4294901760, %v645_v14  ;;  %1016 = vmatpush.msra.mxu2 %v2533_v53  ;;  %v601_v14 = vand.u32 2147483648, %v2515_v47 }
 0x254   :  { %944 = vmatpush.msrb.mxu0 %v2527_v52 }
 0x255   :  { %647 = vmatmul.f32.gmra.mxu0 %v646_v19  ;;  %786 = vmatmul.f32.vlgmr.msra.gmra.mxu1 %v634_v62 }
 0x256   :  { %1147 = vmatpush.msra.mxu1 %v2604_v22 }
 0x25d   :  { %760 = vmatmul.f32.vlgmr.msra.gmra.mxu0 %v634_v62  ;;  %790 = vmatmul.f32.gmra.mxu1 %v642_v9 }
 0x25e   :  { %1109 = vmatpush.msra.mxu0 %v2579_v15 }
 0x265   :  { %764 = vmatmul.f32.gmra.mxu0 %v642_v9  ;;  %v2675_v9 = vld [vmem:[%s2885_s8] ss:$0 sm:$0xff] }
 0x28e   :  { %v823_v20 = vpop.xlane.xlu2 %822 }
 0x28f   :  { %vm827_vm13 = vcmp.eq.f32.partialorder %v2505_v43, %v823_v20 }
 0x290   :  { %v2241_v21 = vsel %vm827_vm13, 1.0, %v2304_v57 }
 0x291   :  { %2243 = vmatmul.msk.f32.vlgmr.msrb.gmra.mxu3 %vm330_vm1, %v2241_v21  ;;  %vm1281_vm14 = vcmp.gt.f32.partialorder %v2241_v21, 0.5  ;;  %v834_v23 = vsel %vm330_vm1, %v2241_v21, 0 }
 0x292   :  { %v2636_v24 = vsel %vm1281_vm14, 1e+30, %v2553_v61  ;;  %v860_v25 = vsub.f32 %v834_v23, %v834_v23  ;;  %1202 = vmatpush.msrb.mxu3 %v2579_v15  ;;  %v602_v23 = vor.u32 1.1754944e-38, %v601_v14 }
 0x293   :  { %v1285_v32 = vsel %vm330_vm1, %v2636_v24, inf }
 0x294   :  { %1286 = vmin.xlane.f32.xlu2 %v1285_v32  ;;  %947 = vmatmul.f32.vlgmr.msrb.gmra.mxu0 %v860_v25  ;;  %v861_v36 = vand.u32 4294901760, %v860_v25 }
 0x295   :  { %1234 = vmatpush.msrb.mxu0 %v2590_v18 }
 0x296   :  { %979 = vmatmul.f32.vlgmr.msrb.gmra.mxu1 %v861_v36  ;;  %v826_v37 = vpop.xlane.xlu2 %825  ;;  %v862_v38 = vsub.f32 %v860_v25, %v861_v36 }
 0x297   :  { %vm828_vm15 = vcmp.eq.f32.partialorder %v2505_v43, %v826_v37  ;;  %1260 = vmatpush.msrb.mxu1 %v2579_v15 }
 0x298   :  { %v2242_v61 = vsel %vm828_vm15, 1.0, %v2304_v57  ;;  %v863_v39 = vand.u32 4294901760, %v862_v38 }
 0x299   :  { %2244 = vmatmul.msk.f32.gmra.mxu3 %vm330_vm1, %v2242_v61  ;;  %vm1282_vm0 = vcmp.gt.f32.partialorder %v2242_v61, 0.5  ;;  %v837_v45 = vsel %vm330_vm1, %v2242_v61, 0 }
 0x29a   :  { %864 = vmatmul.f32.vlgmr.msrb.gmra.mxu2 %v863_v39  ;;  %v2648_v46 = vsel %vm1282_vm0, 1e+30, %v2562_v5  ;;  %v868_v48 = vsub.f32 %v837_v45, %v837_v45  ;;  %v2288_v5 = vpop.eup %2287 }
 0x29b   :  { %v1288_v49 = vsel %vm330_vm1, %v2648_v46, inf  ;;  %1174 = vmatpush.msrb.mxu2 %v2582_v16  ;;  %v576_v58 = vmul.f32 %v2288_v5, %v2508_v44  ;;  %v2290_v60 = vpop.eup %2289  ;;  %vm581_vm2 = vweird.f32 %v2288_v5  ;;  %v599_v44 = vand.u32 2147483647, %v2515_v47 }
 0x29c   :  { %1289 = vmin.xlane.f32.xlu2 %v1288_v49  ;;  %952 = vmatmul.f32.gmra.mxu0 %v868_v48  ;;  %v869_v50 = vand.u32 4294901760, %v868_v48  ;;  %v591_v62 = vmul.f32 %v2290_v60, %v2515_v47  ;;  %vm582_vm4 = vmor %vm580_vm3, %vm581_vm2  ;;  %vm596_vm6 = vweird.f32 %v2290_v60 }
 0x29d   :  { %v577_v59 = vsub.f32 1.0, %v576_v58  ;;  %vm597_vm8 = vmor %vm595_vm7, %vm596_vm6  ;;  %vm600_vm9 = vcmp.eq.f32.partialorder %v599_v44, 8.507059e+37 }
 0x29e   :  { %985 = vmatmul.f32.gmra.mxu1 %v869_v50  ;;  %v870_v54 = vsub.f32 %v868_v48, %v869_v50  ;;  %v592_v0 = vsub.f32 1.0, %v591_v62 }
 0x29f   :  { %v578_v63 = vmul.f32 %v2288_v5, %v577_v59 }
 0x2a0   :  { %v871_v56 = vand.u32 4294901760, %v870_v54  ;;  %v593_v6 = vmul.f32 %v2290_v60, %v592_v0 }
 0x2a1   :  { %2247 = vmatmul.msk.f32.vlgmr.msra.gmra.mxu3 %vm330_vm1, %v2241_v21  ;;  %v579_v1 = vadd.f32 %v2288_v5, %v578_v63 }
 0x2a2   :  { %872 = vmatmul.f32.gmra.mxu2 %v871_v56  ;;  %1367 = vmatpush.msra.mxu3 %v2497_v40  ;;  %v594_v12 = vadd.f32 %v2290_v60, %v593_v6 }
 0x2a3   :  { %v583_v4 = vsel %vm582_vm4, %v2288_v5, %v579_v1  ;;  %v2685_v5 = vld [vmem:[%s2888_s9] ss:$0 sm:$0xff] }
 0x2a4   :  { %1373 = vmatpush.msra.mxu3 %v2499_v41  ;;  %v588_v10 = vsel %vm585_vm5, %v587_v8, %v583_v4  ;;  %vm1060_vm5 = vweird.f32 %v2570_v11 }
 0x2a5   :  { %v608_v19 = vmul.f32 %v2675_v9, %v588_v10 }
 0x2a6   :  { %1379 = vmatpush.msra.mxu3 %v2503_v42 }
 0x2a8   :  { %1385 = vmatpush.msra.mxu3 %v2540_v55 }
 0x2a9   :  { %2248 = vmatmul.msk.f32.gmra.mxu3 %vm330_vm1, %v2242_v61 }
 0x2aa   :  { %2245 = vmatmul.msk.f32.vlgmr.msra.gmra.mxu2 %vm330_vm1, %v2241_v21  ;;  %v598_v21 = vsel %vm597_vm8, %v2290_v60, %v594_v12 }
 0x2ab   :  { %1326 = vmatpush.msra.mxu2 %v2459_v26  ;;  %v603_v32 = vsel %vm600_vm9, %v602_v23, %v598_v21  ;;  %vm1075_vm9 = vweird.f32 %v2587_v17 }
 0x2ad   :  { %1328 = vmatpush.msra.mxu2 %v2461_v27 }
 0x2af   :  { %1330 = vmatpush.msra.mxu2 %v2463_v28 }
 0x2b1   :  { %1332 = vmatpush.msra.mxu2 %v2524_v51 }
 0x2b2   :  { %2246 = vmatmul.msk.f32.gmra.mxu2 %vm330_vm1, %v2242_v61  ;;  %v609_v61 = vmul.f32 %v2675_v9, %v603_v32 }
 0x2c2   :  { %v674_v7 = vpop.f32.mrf.mxu1 }
 0x2ca   :  { %v640_v13 = vpop.f32.mrf.mxu0  ;;  %v678_v25 = vpop.f32.mrf.mxu1 }
 0x2cb   :  { %v641_v20 = vadd.f32 %v640_v13, %v608_v19  ;;  %v702_v37 = vpop.f32.mrf.mxu2 }
 0x2cc   :  { %v731_v48 = vpop.f32.mrf.mxu3 }
 0x2cd   :  { %v675_v36 = vadd.f32 %v674_v7, %v641_v20 }
 0x2cf   :  { %v703_v39 = vadd.f32 %v702_v37, %v675_v36 }
 0x2d1   :  { %v732_v49 = vadd.f32 %v731_v48, %v703_v39 }
 0x2d2   :  { %v648_v38 = vpop.f32.mrf.mxu0  ;;  %v787_v54 = vpop.f32.mrf.mxu1 }
 0x2d3   :  { %v649_v45 = vadd.f32 %v648_v38, %v609_v61  ;;  %v707_v58 = vpop.f32.mrf.mxu2 }
 0x2d4   :  { %v737_v63 = vpop.f32.mrf.mxu3 }
 0x2d5   :  { %v679_v50 = vadd.f32 %v678_v25, %v649_v45 }
 0x2d7   :  { %v708_v59 = vadd.f32 %v707_v58, %v679_v50 }
 0x2d9   :  { %v738_v0 = vadd.f32 %v737_v63, %v708_v59 }
 0x2da   :  { %v761_v56 = vpop.f32.mrf.mxu0  ;;  %v791_v6 = vpop.f32.mrf.mxu1 }
 0x2db   :  { %v762_v47 = vadd.f32 %v761_v56, %v732_v49 }
 0x2dd   :  { %v788_v60 = vadd.f32 %v787_v54, %v762_v47 }
 0x2df   :  { %v797_v62 = vadd.f32 %v2685_v5, %v788_v60 }
 0x2e1   :  { %vm799_vm10 = vcmp.gt.f32.partialorder %v797_v62, 0.0  ;;  %v801_v1 = vmul.f32 0.2, %v797_v62 }
 0x2e2   :  { %v765_v2 = vpop.f32.mrf.mxu0 }
 0x2e3   :  { %v803_v3 = vsel %vm799_vm10, %v797_v62, %v801_v1  ;;  %v766_v4 = vadd.f32 %v765_v2, %v738_v0 }
 0x2e4   :  { %805 = vst.msk [vmem:[%s2889_s10] sm:$0xff] %vm610_vm12, %v803_v3 }
 0x2e5   :  { %v792_v7 = vadd.f32 %v791_v6, %v766_v4 }
 0x2e7   :  { %v798_v8 = vadd.f32 %v2685_v5, %v792_v7 }
 0x2e9   :  { %vm800_vm11 = vcmp.gt.f32.partialorder %v798_v8, 0.0  ;;  %v802_v10 = vmul.f32 0.2, %v798_v8 }
 0x2eb   :  { %v804_v12 = vsel %vm800_vm11, %v798_v8, %v802_v10 }
 0x2ec   :  { %806 = vst.msk [vmem:[%s2889_s10 + $0x8] sm:$0xff] %vm610_vm12, %v804_v12 }
 0x307   :  { %v2697_v13 = vpop.xlane.xlu2 %1286 }
 0x308   :  { %vm1291_vm13 = vcmp.eq.f32.partialorder %v2636_v24, %v2697_v13  ;;  %2295 = vrcp.f32 %v2697_v13 }
 0x309   :  { %v1293_v14 = vsel %vm1291_vm13, %v2505_v43, 32.0 }
 0x30a   :  { %v1295_v19 = vsel %vm330_vm1, %v1293_v14, inf }
 0x30b   :  { %1296 = vmin.xlane.f32.xlu0 %v1295_v19 }
 0x30f   :  { %v2703_v44 = vpop.xlane.xlu2 %1289 }
 0x310   :  { %vm1292_vm14 = vcmp.eq.f32.partialorder %v2648_v46, %v2703_v44  ;;  %2297 = vrcp.f32 %v2703_v44 }
 0x311   :  { %v1294_v20 = vsel %vm1292_vm14, %v2505_v43, 32.0  ;;  %v948_v37 = vpop.f32.mrf.mxu0 }
 0x312   :  { %v1298_v21 = vsel %vm330_vm1, %v1294_v20, inf }
 0x313   :  { %1299 = vmin.xlane.f32.xlu1 %v1298_v21  ;;  %v980_v39 = vpop.f32.mrf.mxu1 }
 0x314   :  { %v914_v23 = vpop.f32.mrf.mxu3 }
 0x319   :  { %v953_v56 = vpop.f32.mrf.mxu0 }
 0x31b   :  { %v986_v60 = vpop.f32.mrf.mxu1 }
 0x31c   :  { %v918_v32 = vpop.f32.mrf.mxu3 }
 0x31d   :  { %v865_v25 = vpop.f32.mrf.mxu2 }
 0x31e   :  { %v915_v36 = vadd.f32 %v914_v23, %v865_v25 }
 0x320   :  { %v949_v61 = vadd.f32 %v948_v37, %v915_v36 }
 0x322   :  { %v981_v48 = vadd.f32 %v980_v39, %v949_v61 }
 0x324   :  { %v1048_v49 = vpop.f32.mrf.mxu3 }
 0x325   :  { %v873_v38 = vpop.f32.mrf.mxu2 }
 0x326   :  { %v919_v45 = vadd.f32 %v918_v32, %v873_v38 }
 0x328   :  { %v954_v47 = vadd.f32 %v953_v56, %v919_v45 }
 0x32a   :  { %v987_v63 = vadd.f32 %v986_v60, %v954_v47 }
 0x32c   :  { %v1052_v3 = vpop.f32.mrf.mxu3 }
 0x32d   :  { %v1019_v50 = vpop.f32.mrf.mxu2 }
 0x32e   :  { %v1020_v54 = vadd.f32 %v1019_v50, %v981_v48 }
 0x330   :  { %v1049_v58 = vadd.f32 %v1048_v49, %v1020_v54 }
 0x332   :  { %v1088_v59 = vsel %vm610_vm12, %v1049_v58, 0 }
 0x333   :  { %v1110_v62 = vand.u32 4294901760, %v1088_v59 }
 0x335   :  { %v1111_v0 = vsub.f32 %v1088_v59, %v1110_v62  ;;  %v1023_v1 = vpop.f32.mrf.mxu2  ;;  %1149 = vmatmul.f32.vlgmr.msra.gmra.mxu1 %v1110_v62 }
 0x336   :  { %v1024_v2 = vadd.f32 %v1023_v1, %v987_v63  ;;  %1443 = vmatpush.msra.mxu1 %v2459_v26  ;;  %v1064_v1 = vand.u32 2147483647, %v2570_v11 }
 0x337   :  { %1177 = vmatmul.f32.vlgmr.msrb.gmra.mxu2 %v1111_v0  ;;  %v1112_v4 = vand.u32 4294901760, %v1111_v0 }
 0x338   :  { %v1053_v6 = vadd.f32 %v1052_v3, %v1024_v2  ;;  %1445 = vmatpush.msra.mxu1 %v2461_v27  ;;  %1478 = vmatpush.msrb.mxu2 %v2477_v33  ;;  %vm1065_vm7 = vcmp.eq.f32.partialorder %v1064_v1, 8.507059e+37 }
 0x339   :  { %1206 = vmatmul.f32.vlgmr.msrb.gmra.mxu3 %v1112_v4  ;;  %v1113_v7 = vsub.f32 %v1111_v0, %v1112_v4  ;;  %v1066_v0 = vand.u32 2147483648, %v2570_v11 }
 0x33a   :  { %v1091_v8 = vsel %vm610_vm12, %v1053_v6, 0  ;;  %1447 = vmatpush.msra.mxu1 %v2463_v28  ;;  %1513 = vmatpush.msrb.mxu3 %v2459_v26 }
 0x33b   :  { %v1118_v10 = vand.u32 4294901760, %v1091_v8  ;;  %v1114_v12 = vand.u32 4294901760, %v1113_v7  ;;  %1482 = vmatpush.msrb.mxu2 %v2480_v34  ;;  %v1067_v6 = vor.u32 1.1754944e-38, %v1066_v0 }
 0x33c   :  { %1449 = vmatpush.msra.mxu1 %v2524_v51  ;;  %1515 = vmatpush.msrb.mxu3 %v2461_v27 }
 0x33d   :  { %1115 = vmatmul.f32.vlgmr.msra.gmra.mxu0 %v1114_v12  ;;  %1153 = vmatmul.f32.gmra.mxu1 %v1118_v10  ;;  %v1119_v14 = vsub.f32 %v1091_v8, %v1118_v10  ;;  %v1081_v12 = vand.u32 2147483648, %v2587_v17 }
 0x33e   :  { %1409 = vmatpush.msra.mxu0 %v2466_v29  ;;  %1517 = vmatpush.msrb.mxu3 %v2463_v28 }
 0x33f   :  { %1182 = vmatmul.f32.gmra.mxu2 %v1119_v14  ;;  %v1120_v19 = vand.u32 4294901760, %v1119_v14 }
 0x340   :  { %1412 = vmatpush.msra.mxu0 %v2469_v30  ;;  %1519 = vmatpush.msrb.mxu3 %v2524_v51 }
 0x341   :  { %1212 = vmatmul.f32.gmra.mxu3 %v1120_v19  ;;  %v1121_v20 = vsub.f32 %v1119_v14, %v1120_v19  ;;  %1486 = vmatpush.msrb.mxu2 %v2484_v35  ;;  %v1079_v19 = vand.u32 2147483647, %v2587_v17 }
 0x342   :  { %1415 = vmatpush.msra.mxu0 %v2472_v31 }
 0x343   :  { %v1122_v21 = vand.u32 4294901760, %v1121_v20  ;;  %1490 = vmatpush.msrb.mxu2 %v2533_v53  ;;  %vm1080_vm11 = vcmp.eq.f32.partialorder %v1079_v19, 8.507059e+37 }
 0x344   :  { %1418 = vmatpush.msra.mxu0 %v2527_v52 }
 0x345   :  { %1123 = vmatmul.f32.gmra.mxu0 %v1122_v21  ;;  %1262 = vmatmul.f32.vlgmr.msrb.gmra.mxu1 %v1110_v62  ;;  %v1082_v21 = vor.u32 1.1754944e-38, %v1081_v12 }
 0x346   :  { %1621 = vmatpush.msrb.mxu1 %v2604_v22 }
 0x34d   :  { %1236 = vmatmul.f32.vlgmr.msrb.gmra.mxu0 %v1110_v62  ;;  %1266 = vmatmul.f32.gmra.mxu1 %v1118_v10 }
 0x34e   :  { %1583 = vmatpush.msrb.mxu0 %v2579_v15 }
 0x355   :  { %1240 = vmatmul.f32.gmra.mxu0 %v1118_v10 }
 0x37e   :  { %v1297_v23 = vpop.xlane.xlu0 %1296 }
 0x37f   :  { %vm1301_vm15 = vcmp.eq.f32.partialorder %v2505_v43, %v1297_v23 }
 0x380   :  { %v2251_v25 = vsel %vm1301_vm15, 1.0, %v2304_v57 }
 0x381   :  { %2253 = vmatmul.msk.f32.vlgmr.msra.gmra.mxu3 %vm330_vm1, %v2251_v25  ;;  %vm1755_vm0 = vcmp.gt.f32.partialorder %v2251_v25, 0.5  ;;  %v1308_v32 = vsel %vm330_vm1, %v2251_v25, 0 }
 0x382   :  { %v2734_v36 = vsel %vm1755_vm0, 1e+30, %v2636_v24  ;;  %v1334_v37 = vsub.f32 %v1308_v32, %v1308_v32  ;;  %1676 = vmatpush.msra.mxu3 %v2579_v15 }
 0x383   :  { %v1759_v38 = vsel %vm330_vm1, %v2734_v36, inf }
 0x384   :  { %1760 = vmin.xlane.f32.xlu2 %v1759_v38  ;;  %1421 = vmatmul.f32.vlgmr.msra.gmra.mxu0 %v1334_v37  ;;  %v1335_v61 = vand.u32 4294901760, %v1334_v37 }
 0x385   :  { %1708 = vmatpush.msra.mxu0 %v2590_v18 }
 0x386   :  { %1453 = vmatmul.f32.vlgmr.msra.gmra.mxu1 %v1335_v61  ;;  %v1300_v39 = vpop.xlane.xlu1 %1299  ;;  %v1336_v45 = vsub.f32 %v1334_v37, %v1335_v61 }
 0x387   :  { %vm1302_vm2 = vcmp.eq.f32.partialorder %v2505_v43, %v1300_v39  ;;  %1734 = vmatpush.msra.mxu1 %v2579_v15 }
 0x388   :  { %v2252_v24 = vsel %vm1302_vm2, 1.0, %v2304_v57  ;;  %v1337_v48 = vand.u32 4294901760, %v1336_v45 }
 0x389   :  { %2254 = vmatmul.msk.f32.gmra.mxu3 %vm330_vm1, %v2252_v24  ;;  %vm1756_vm3 = vcmp.gt.f32.partialorder %v2252_v24, 0.5  ;;  %v1311_v49 = vsel %vm330_vm1, %v2252_v24, 0 }
 0x38a   :  { %1338 = vmatmul.f32.vlgmr.msra.gmra.mxu2 %v1337_v48  ;;  %v2746_v50 = vsel %vm1756_vm3, 1e+30, %v2648_v46  ;;  %v1342_v54 = vsub.f32 %v1311_v49, %v1311_v49 }
 0x38b   :  { %v1762_v56 = vsel %vm330_vm1, %v2746_v50, inf  ;;  %1648 = vmatpush.msra.mxu2 %v2582_v16 }
 0x38c   :  { %1763 = vmin.xlane.f32.xlu0 %v1762_v56  ;;  %1426 = vmatmul.f32.gmra.mxu0 %v1342_v54  ;;  %v1343_v47 = vand.u32 4294901760, %v1342_v54 }
 0x38e   :  { %1459 = vmatmul.f32.gmra.mxu1 %v1343_v47  ;;  %v1344_v58 = vsub.f32 %v1342_v54, %v1343_v47 }
 0x390   :  { %v1345_v59 = vand.u32 4294901760, %v1344_v58 }
 0x391   :  { %2257 = vmatmul.msk.f32.vlgmr.msrb.gmra.mxu3 %vm330_vm1, %v2251_v25 }
 0x392   :  { %1346 = vmatmul.f32.gmra.mxu2 %v1345_v59  ;;  %1841 = vmatpush.msrb.mxu3 %v2497_v40  ;;  %v2292_v40 = vpop.eup %2291 }
 0x393   :  { %vm1061_vm4 = vweird.f32 %v2292_v40 }
 0x394   :  { %1847 = vmatpush.msrb.mxu3 %v2499_v41  ;;  %v1056_v41 = vmul.f32 %v2292_v40, %v2570_v11  ;;  %vm1062_vm6 = vmor %vm1060_vm5, %vm1061_vm4  ;;  %vm1534_vm5 = vweird.f32 %v2697_v13 }
 0x396   :  { %1853 = vmatpush.msrb.mxu3 %v2503_v42  ;;  %v1057_v42 = vsub.f32 1.0, %v1056_v41 }
 0x398   :  { %1859 = vmatpush.msrb.mxu3 %v2540_v55  ;;  %v2294_v55 = vpop.eup %2293  ;;  %v1058_v60 = vmul.f32 %v2292_v40, %v1057_v42 }
 0x399   :  { %2258 = vmatmul.msk.f32.gmra.mxu3 %vm330_vm1, %v2252_v24  ;;  %v1071_v46 = vmul.f32 %v2294_v55, %v2587_v17  ;;  %vm1076_vm8 = vweird.f32 %v2294_v55 }
 0x39a   :  { %2255 = vmatmul.msk.f32.vlgmr.msrb.gmra.mxu2 %vm330_vm1, %v2251_v25  ;;  %v1059_v63 = vadd.f32 %v2292_v40, %v1058_v60  ;;  %vm1077_vm10 = vmor %vm1075_vm9, %vm1076_vm8  ;;  %vm1549_vm8 = vweird.f32 %v2703_v44 }
 0x39b   :  { %1800 = vmatpush.msrb.mxu2 %v2459_v26  ;;  %v1072_v62 = vsub.f32 1.0, %v1071_v46 }
 0x39c   :  { %v1063_v2 = vsel %vm1062_vm6, %v2292_v40, %v1059_v63 }
 0x39d   :  { %1802 = vmatpush.msrb.mxu2 %v2461_v27  ;;  %v1073_v3 = vmul.f32 %v2294_v55, %v1072_v62  ;;  %v1068_v7 = vsel %vm1065_vm7, %v1067_v6, %v1063_v2 }
 0x39e   :  { %v1085_v14 = vmul.f32 %v2675_v9, %v1068_v7 }
 0x39f   :  { %1804 = vmatpush.msrb.mxu2 %v2463_v28  ;;  %v1074_v8 = vadd.f32 %v2294_v55, %v1073_v3 }
 0x3a1   :  { %1806 = vmatpush.msrb.mxu2 %v2524_v51  ;;  %v1078_v20 = vsel %vm1077_vm10, %v2294_v55, %v1074_v8 }
 0x3a2   :  { %2256 = vmatmul.msk.f32.gmra.mxu2 %vm330_vm1, %v2252_v24  ;;  %v1083_v25 = vsel %vm1080_vm11, %v1082_v21, %v1078_v20 }
 0x3a3   :  { %v1086_v61 = vmul.f32 %v2675_v9, %v1083_v25 }
 0x3b2   :  { %v1150_v4 = vpop.f32.mrf.mxu1 }
 0x3ba   :  { %v1116_v10 = vpop.f32.mrf.mxu0  ;;  %v1154_v23 = vpop.f32.mrf.mxu1 }
 0x3bb   :  { %v1117_v11 = vadd.f32 %v1116_v10, %v1085_v14  ;;  %v1178_v37 = vpop.f32.mrf.mxu2 }
 0x3bc   :  { %v1207_v24 = vpop.f32.mrf.mxu3 }
 0x3bd   :  { %v1151_v32 = vadd.f32 %v1150_v4, %v1117_v11 }
 0x3bf   :  { %v1179_v39 = vadd.f32 %v1178_v37, %v1151_v32 }
 0x3c1   :  { %v1208_v48 = vadd.f32 %v1207_v24, %v1179_v39 }
 0x3c2   :  { %v1124_v38 = vpop.f32.mrf.mxu0  ;;  %v1263_v54 = vpop.f32.mrf.mxu1 }
 0x3c3   :  { %v1125_v45 = vadd.f32 %v1124_v38, %v1086_v61  ;;  %v1183_v47 = vpop.f32.mrf.mxu2 }
 0x3c4   :  { %v1213_v41 = vpop.f32.mrf.mxu3 }
 0x3c5   :  { %v1155_v49 = vadd.f32 %v1154_v23, %v1125_v45 }
 0x3c7   :  { %v1184_v58 = vadd.f32 %v1183_v47, %v1155_v49 }
 0x3c9   :  { %v1214_v42 = vadd.f32 %v1213_v41, %v1184_v58 }
 0x3ca   :  { %v1237_v56 = vpop.f32.mrf.mxu0  ;;  %v1267_v63 = vpop.f32.mrf.mxu1 }
 0x3cb   :  { %v1238_v17 = vadd.f32 %v1237_v56, %v1208_v48 }
 0x3cd   :  { %v1264_v59 = vadd.f32 %v1263_v54, %v1238_v17 }
 0x3cf   :  { %v1270_v40 = vadd.f32 %v2685_v5, %v1264_v59 }
 0x3d1   :  { %vm1272_vm13 = vcmp.gt.f32.partialorder %v1270_v40, 0.0  ;;  %v1274_v55 = vmul.f32 0.2, %v1270_v40 }
 0x3d2   :  { %v1241_v46 = vpop.f32.mrf.mxu0 }
 0x3d3   :  { %v1276_v60 = vsel %vm1272_vm13, %v1270_v40, %v1274_v55  ;;  %v1242_v62 = vadd.f32 %v1241_v46, %v1214_v42 }
 0x3d4   :  { %2249 = vst.msk [vmem:[%s2889_s10 + $0x10] sm:$0xff] %vm610_vm12, %v1276_v60 }
 0x3d5   :  { %v1268_v0 = vadd.f32 %v1267_v63, %v1242_v62 }
 0x3d7   :  { %v1271_v1 = vadd.f32 %v2685_v5, %v1268_v0 }
 0x3d9   :  { %vm1273_vm14 = vcmp.gt.f32.partialorder %v1271_v1, 0.0  ;;  %v1275_v2 = vmul.f32 0.2, %v1271_v1 }
 0x3db   :  { %v1277_v3 = vsel %vm1273_vm14, %v1271_v1, %v1275_v2 }
 0x3dc   :  { %2250 = vst.msk [vmem:[%s2889_s10 + $0x18] sm:$0xff] %vm610_vm12, %v1277_v3 }
 0x3f7   :  { %v2785_v4 = vpop.xlane.xlu2 %1760 }
 0x3f8   :  { %vm1765_vm15 = vcmp.eq.f32.partialorder %v2734_v36, %v2785_v4  ;;  %2299 = vrcp.f32 %v2785_v4 }
 0x3f9   :  { %v1767_v6 = vsel %vm1765_vm15, %v2505_v43, 32.0  ;;  %vm2008_vm15 = vweird.f32 %v2785_v4 }
 0x3fa   :  { %v1769_v7 = vsel %vm330_vm1, %v1767_v6, inf }
 0x3fb   :  { %1770 = vmin.xlane.f32.xlu1 %v1769_v7 }
 0x3ff   :  { %v2791_v8 = vpop.xlane.xlu0 %1763 }
 0x400   :  { %vm1766_vm0 = vcmp.eq.f32.partialorder %v2746_v50, %v2791_v8  ;;  %2301 = vrcp.f32 %v2791_v8 }
 0x401   :  { %v1768_v10 = vsel %vm1766_vm0, %v2505_v43, 32.0  ;;  %v1422_v36 = vpop.f32.mrf.mxu0 }
 0x402   :  { %v1772_v12 = vsel %vm330_vm1, %v1768_v10, inf  ;;  %v1540_v10 = vand.u32 2147483648, %v2697_v13 }
 0x403   :  { %1773 = vmin.xlane.f32.xlu2 %v1772_v12  ;;  %v1454_v25 = vpop.f32.mrf.mxu1  ;;  %v1538_v12 = vand.u32 2147483647, %v2697_v13 }
 0x404   :  { %v1388_v14 = vpop.f32.mrf.mxu3 }
 0x409   :  { %v1427_v45 = vpop.f32.mrf.mxu0 }
 0x40b   :  { %v1460_v49 = vpop.f32.mrf.mxu1 }
 0x40c   :  { %v1392_v11 = vpop.f32.mrf.mxu3 }
 0x40d   :  { %v1339_v19 = vpop.f32.mrf.mxu2 }
 0x40e   :  { %v1389_v20 = vadd.f32 %v1388_v14, %v1339_v19 }
 0x410   :  { %v1423_v23 = vadd.f32 %v1422_v36, %v1389_v20  ;;  %v1541_v20 = vor.u32 1.1754944e-38, %v1540_v10 }
 0x412   :  { %v1455_v37 = vadd.f32 %v1454_v25, %v1423_v23  ;;  %v1555_v25 = vand.u32 2147483648, %v2703_v44 }
 0x414   :  { %v1522_v38 = vpop.f32.mrf.mxu3 }
 0x415   :  { %v1347_v21 = vpop.f32.mrf.mxu2 }
 0x416   :  { %v1393_v32 = vadd.f32 %v1392_v11, %v1347_v21 }
 0x418   :  { %v1428_v50 = vadd.f32 %v1427_v45, %v1393_v32 }
 0x41a   :  { %v1461_v56 = vadd.f32 %v1460_v49, %v1428_v50 }
 0x41c   :  { %v1526_v59 = vpop.f32.mrf.mxu3 }
 0x41d   :  { %v1493_v61 = vpop.f32.mrf.mxu2 }
 0x41e   :  { %v1494_v39 = vadd.f32 %v1493_v61, %v1455_v37  ;;  %v1553_v37 = vand.u32 2147483647, %v2703_v44  ;;  %v1556_v61 = vor.u32 1.1754944e-38, %v1555_v25 }
 0x420   :  { %v1523_v24 = vadd.f32 %v1522_v38, %v1494_v39  ;;  %vm1554_vm10 = vcmp.eq.f32.partialorder %v1553_v37, 8.507059e+37 }
 0x422   :  { %v1562_v48 = vsel %vm610_vm12, %v1523_v24, 0 }
 0x423   :  { %v1584_v54 = vand.u32 4294901760, %v1562_v48 }
 0x425   :  { %v1585_v17 = vsub.f32 %v1562_v48, %v1584_v54  ;;  %v1497_v47 = vpop.f32.mrf.mxu2  ;;  %1623 = vmatmul.f32.vlgmr.msrb.gmra.mxu1 %v1584_v54 }
 0x426   :  { %v1498_v58 = vadd.f32 %v1497_v47, %v1461_v56  ;;  %1917 = vmatpush.msrb.mxu1 %v2459_v26 }
 0x427   :  { %1651 = vmatmul.f32.vlgmr.msra.gmra.mxu2 %v1585_v17  ;;  %v1586_v40 = vand.u32 4294901760, %v1585_v17 }
 0x428   :  { %v1527_v41 = vadd.f32 %v1526_v59, %v1498_v58  ;;  %1919 = vmatpush.msrb.mxu1 %v2461_v27  ;;  %1952 = vmatpush.msra.mxu2 %v2477_v33 }
 0x429   :  { %1680 = vmatmul.f32.vlgmr.msra.gmra.mxu3 %v1586_v40  ;;  %v1587_v42 = vsub.f32 %v1585_v17, %v1586_v40 }
 0x42a   :  { %v1565_v55 = vsel %vm610_vm12, %v1527_v41, 0  ;;  %1921 = vmatpush.msrb.mxu1 %v2463_v28  ;;  %1987 = vmatpush.msra.mxu3 %v2459_v26 }
 0x42b   :  { %v1592_v46 = vand.u32 4294901760, %v1565_v55  ;;  %v1588_v60 = vand.u32 4294901760, %v1587_v42  ;;  %1956 = vmatpush.msra.mxu2 %v2480_v34 }
 0x42c   :  { %1923 = vmatpush.msrb.mxu1 %v2524_v51  ;;  %1989 = vmatpush.msra.mxu3 %v2461_v27 }
 0x42d   :  { %1589 = vmatmul.f32.vlgmr.msrb.gmra.mxu0 %v1588_v60  ;;  %1627 = vmatmul.f32.gmra.mxu1 %v1592_v46  ;;  %v1593_v62 = vsub.f32 %v1565_v55, %v1592_v46 }
 0x42e   :  { %1883 = vmatpush.msrb.mxu0 %v2466_v29  ;;  %1991 = vmatpush.msra.mxu3 %v2463_v28 }
 0x42f   :  { %1656 = vmatmul.f32.gmra.mxu2 %v1593_v62  ;;  %v1594_v33 = vand.u32 4294901760, %v1593_v62 }
 0x430   :  { %1886 = vmatpush.msrb.mxu0 %v2469_v30  ;;  %1993 = vmatpush.msra.mxu3 %v2524_v51 }
 0x431   :  { %1686 = vmatmul.f32.gmra.mxu3 %v1594_v33  ;;  %v1595_v26 = vsub.f32 %v1593_v62, %v1594_v33  ;;  %1960 = vmatpush.msra.mxu2 %v2484_v35 }
 0x432   :  { %1889 = vmatpush.msrb.mxu0 %v2472_v31 }
 0x433   :  { %v1596_v27 = vand.u32 4294901760, %v1595_v26  ;;  %1964 = vmatpush.msra.mxu2 %v2533_v53 }
 0x434   :  { %1892 = vmatpush.msrb.mxu0 %v2527_v52 }
 0x435   :  { %1597 = vmatmul.f32.gmra.mxu0 %v1596_v27  ;;  %1736 = vmatmul.f32.vlgmr.msra.gmra.mxu1 %v1584_v54 }
 0x436   :  { %2095 = vmatpush.msra.mxu1 %v2604_v22 }
 0x43d   :  { %1710 = vmatmul.f32.vlgmr.msra.gmra.mxu0 %v1584_v54  ;;  %1740 = vmatmul.f32.gmra.mxu1 %v1592_v46 }
 0x43e   :  { %2057 = vmatpush.msra.mxu0 %v2579_v15 }
 0x445   :  { %1714 = vmatmul.f32.gmra.mxu0 %v1592_v46 }
 0x46e   :  { %v1771_v28 = vpop.xlane.xlu1 %1770 }
 0x46f   :  { %vm1775_vm2 = vcmp.eq.f32.partialorder %v2505_v43, %v1771_v28 }
 0x470   :  { %v2261_v29 = vsel %vm1775_vm2, 1.0, %v2304_v57 }
 0x471   :  { %v1782_v30 = vsel %vm330_vm1, %v2261_v29, 0  ;;  %2263 = vmatmul.msk.f32.vlgmr.msrb.gmra.mxu3 %vm330_vm1, %v2261_v29 }
 0x472   :  { %v1808_v31 = vsub.f32 %v1782_v30, %v1782_v30  ;;  %2150 = vmatpush.msrb.mxu3 %v2579_v15 }
 0x474   :  { %1895 = vmatmul.f32.vlgmr.msrb.gmra.mxu0 %v1808_v31  ;;  %v1809_v34 = vand.u32 4294901760, %v1808_v31 }
 0x475   :  { %2182 = vmatpush.msrb.mxu0 %v2590_v18 }
 0x476   :  { %1927 = vmatmul.f32.vlgmr.msrb.gmra.mxu1 %v1809_v34  ;;  %v1774_v35 = vpop.xlane.xlu2 %1773  ;;  %v1810_v51 = vsub.f32 %v1808_v31, %v1809_v34 }
 0x477   :  { %vm1776_vm3 = vcmp.eq.f32.partialorder %v2505_v43, %v1774_v35  ;;  %2208 = vmatpush.msrb.mxu1 %v2579_v15  ;;  %v2296_v43 = vpop.eup %2295 }
 0x478   :  { %v2262_v52 = vsel %vm1776_vm3, 1.0, %v2304_v57  ;;  %v1811_v53 = vand.u32 4294901760, %v1810_v51  ;;  %v1530_v57 = vmul.f32 %v2296_v43, %v2697_v13  ;;  %vm1535_vm4 = vweird.f32 %v2296_v43 }
 0x479   :  { %2264 = vmatmul.msk.f32.gmra.mxu3 %vm330_vm1, %v2262_v52  ;;  %v1785_v22 = vsel %vm330_vm1, %v2262_v52, 0  ;;  %vm1536_vm6 = vmor %vm1534_vm5, %vm1535_vm4  ;;  %vm2023_vm4 = vweird.f32 %v2791_v8 }
 0x47a   :  { %1812 = vmatmul.f32.vlgmr.msrb.gmra.mxu2 %v1811_v53  ;;  %v1816_v63 = vsub.f32 %v1785_v22, %v1785_v22  ;;  %v1531_v15 = vsub.f32 1.0, %v1530_v57 }
 0x47b   :  { %2122 = vmatpush.msrb.mxu2 %v2582_v16  ;;  %v2298_v16 = vpop.eup %2297 }
 0x47c   :  { %1900 = vmatmul.f32.gmra.mxu0 %v1816_v63  ;;  %v1817_v18 = vand.u32 4294901760, %v1816_v63  ;;  %v1545_v2 = vmul.f32 %v2298_v16, %v2703_v44  ;;  %v1532_v3 = vmul.f32 %v2296_v43, %v1531_v15  ;;  %vm1550_vm7 = vweird.f32 %v2298_v16 }
 0x47d   :  { %vm1551_vm9 = vmor %vm1549_vm8, %vm1550_vm7 }
 0x47e   :  { %1933 = vmatmul.f32.gmra.mxu1 %v1817_v18  ;;  %v1818_v0 = vsub.f32 %v1816_v63, %v1817_v18  ;;  %v1546_v6 = vsub.f32 1.0, %v1545_v2  ;;  %v1533_v7 = vadd.f32 %v2296_v43, %v1532_v3 }
 0x480   :  { %v1819_v1 = vand.u32 4294901760, %v1818_v0  ;;  %v1537_v14 = vsel %vm1536_vm6, %v2296_v43, %v1533_v7  ;;  %v1547_v19 = vmul.f32 %v2298_v16, %v1546_v6 }
 0x481   :  { %2267 = vmatmul.msk.f32.vlgmr.msra.gmra.mxu3 %vm330_vm1, %v2261_v29 }
 0x482   :  { %1820 = vmatmul.f32.gmra.mxu2 %v1819_v1  ;;  %v1548_v21 = vadd.f32 %v2298_v16, %v1547_v19 }
 0x484   :  { %v1552_v38 = vsel %vm1551_vm9, %v2298_v16, %v1548_v21 }
 0x485   :  { %v1557_v45 = vsel %vm1554_vm10, %v1556_v61, %v1552_v38 }
 0x486   :  { %v1560_v49 = vmul.f32 %v2675_v9, %v1557_v45 }
 0x489   :  { %2268 = vmatmul.msk.f32.gmra.mxu3 %vm330_vm1, %v2262_v52 }
 0x48a   :  { %2265 = vmatmul.msk.f32.vlgmr.msra.gmra.mxu2 %vm330_vm1, %v2261_v29 }
 0x492   :  { %2266 = vmatmul.msk.f32.gmra.mxu2 %vm330_vm1, %v2262_v52  ;;  %vm1539_vm1 = vcmp.eq.f32.partialorder %v1538_v12, 8.507059e+37 }
 0x493   :  { %v1542_v36 = vsel %vm1539_vm1, %v1541_v20, %v1537_v14 }
 0x494   :  { %v1559_v32 = vmul.f32 %v2675_v9, %v1542_v36 }
 0x4a2   :  { %v1624_v11 = vpop.f32.mrf.mxu1 }
 0x4aa   :  { %v1590_v23 = vpop.f32.mrf.mxu0  ;;  %v1628_v39 = vpop.f32.mrf.mxu1 }
 0x4ab   :  { %v1591_v13 = vadd.f32 %v1590_v23, %v1559_v32  ;;  %v1652_v24 = vpop.f32.mrf.mxu2 }
 0x4ac   :  { %v1681_v17 = vpop.f32.mrf.mxu3 }
 0x4ad   :  { %v1625_v50 = vadd.f32 %v1624_v11, %v1591_v13 }
 0x4af   :  { %v1653_v54 = vadd.f32 %v1652_v24, %v1625_v50  ;;  %v2300_v24 = vpop.eup %2299 }
 0x4b0   :  { %vm2009_vm14 = vweird.f32 %v2300_v24 }
 0x4b1   :  { %v1682_v47 = vadd.f32 %v1681_v17, %v1653_v54  ;;  %v2302_v54 = vpop.eup %2301  ;;  %vm2010_vm0 = vmor %vm2008_vm15, %vm2009_vm14 }
 0x4b2   :  { %v1598_v48 = vpop.f32.mrf.mxu0  ;;  %v1737_v59 = vpop.f32.mrf.mxu1  ;;  %vm2024_vm3 = vweird.f32 %v2302_v54 }
 0x4b3   :  { %v1599_v56 = vadd.f32 %v1598_v48, %v1560_v49  ;;  %v1657_v41 = vpop.f32.mrf.mxu2  ;;  %v2004_v48 = vmul.f32 %v2300_v24, %v2785_v4  ;;  %vm2025_vm5 = vmor %vm2023_vm4, %vm2024_vm3 }
 0x4b4   :  { %v1687_v60 = vpop.f32.mrf.mxu3 }
 0x4b5   :  { %v1629_v58 = vadd.f32 %v1628_v39, %v1599_v56  ;;  %v2005_v49 = vsub.f32 1.0, %v2004_v48  ;;  %v2019_v56 = vmul.f32 %v2302_v54, %v2791_v8 }
 0x4b7   :  { %v1658_v42 = vadd.f32 %v1657_v41, %v1629_v58  ;;  %v2006_v17 = vmul.f32 %v2300_v24, %v2005_v49 }
 0x4b9   :  { %v1688_v62 = vadd.f32 %v1687_v60, %v1658_v42  ;;  %v2007_v58 = vadd.f32 %v2300_v24, %v2006_v17 }
 0x4ba   :  { %v1711_v40 = vpop.f32.mrf.mxu0  ;;  %v1741_v29 = vpop.f32.mrf.mxu1 }
 0x4bb   :  { %v1712_v44 = vadd.f32 %v1711_v40, %v1682_v47  ;;  %v2020_v47 = vsub.f32 1.0, %v2019_v56  ;;  %v2012_v40 = vand.u32 2147483647, %v2785_v4  ;;  %v2011_v41 = vsel %vm2010_vm0, %v2300_v24, %v2007_v58 }
 0x4bd   :  { %v1738_v55 = vadd.f32 %v1737_v59, %v1712_v44  ;;  %v2014_v59 = vand.u32 2147483648, %v2785_v4  ;;  %v2021_v44 = vmul.f32 %v2302_v54, %v2020_v47  ;;  %vm2013_vm2 = vcmp.eq.f32.partialorder %v2012_v40, 8.507059e+37 }
 0x4bf   :  { %v1744_v46 = vadd.f32 %v2685_v5, %v1738_v55  ;;  %v2015_v55 = vor.u32 1.1754944e-38, %v2014_v59  ;;  %v2022_v60 = vadd.f32 %v2302_v54, %v2021_v44 }
 0x4c1   :  { %vm1746_vm11 = vcmp.gt.f32.partialorder %v1744_v46, 0.0  ;;  %v1748_v33 = vmul.f32 0.2, %v1744_v46 }
 0x4c2   :  { %v1715_v26 = vpop.f32.mrf.mxu0 }
 0x4c3   :  { %v1750_v27 = vsel %vm1746_vm11, %v1744_v46, %v1748_v33  ;;  %v1716_v28 = vadd.f32 %v1715_v26, %v1688_v62  ;;  %v2016_v46 = vsel %vm2013_vm2, %v2015_v55, %v2011_v41  ;;  %v2029_v33 = vand.u32 2147483648, %v2791_v8 }
 0x4c4   :  { %2259 = vst.msk [vmem:[%s2889_s10 + $0x20] sm:$0xff] %vm610_vm12, %v1750_v27  ;;  %v2033_v26 = vmul.f32 %v2675_v9, %v2016_v46  ;;  %v2027_v27 = vand.u32 2147483647, %v2791_v8 }
 0x4c5   :  { %v1742_v30 = vadd.f32 %v1741_v29, %v1716_v28  ;;  %v2026_v28 = vsel %vm2025_vm5, %v2302_v54, %v2022_v60  ;;  %v2030_v29 = vor.u32 1.1754944e-38, %v2029_v33 }
 0x4c6   :  { %vm2028_vm6 = vcmp.eq.f32.partialorder %v2027_v27, 8.507059e+37 }
 0x4c7   :  { %v1745_v31 = vadd.f32 %v2685_v5, %v1742_v30 }
 0x4c9   :  { %vm1747_vm13 = vcmp.gt.f32.partialorder %v1745_v31, 0.0  ;;  %v1749_v34 = vmul.f32 0.2, %v1745_v31 }
 0x4cb   :  { %v1751_v35 = vsel %vm1747_vm13, %v1745_v31, %v1749_v34  ;;  %v2031_v31 = vsel %vm2028_vm6, %v2030_v29, %v2026_v28 }
 0x4cc   :  { %2260 = vst.msk [vmem:[%s2889_s10 + $0x28] sm:$0xff] %vm610_vm12, %v1751_v35 }
 0x4f1   :  { %v1896_v63 = vpop.f32.mrf.mxu0 }
 0x4f3   :  { %v1928_v1 = vpop.f32.mrf.mxu1 }
 0x4f4   :  { %v1862_v51 = vpop.f32.mrf.mxu3 }
 0x4f9   :  { %v1901_v3 = vpop.f32.mrf.mxu0 }
 0x4fb   :  { %v1934_v12 = vpop.f32.mrf.mxu1 }
 0x4fc   :  { %v1866_v53 = vpop.f32.mrf.mxu3 }
 0x4fd   :  { %v1813_v52 = vpop.f32.mrf.mxu2 }
 0x4fe   :  { %v1863_v22 = vadd.f32 %v1862_v51, %v1813_v52  ;;  %v2034_v52 = vmul.f32 %v2675_v9, %v2031_v31 }
 0x500   :  { %v1897_v0 = vadd.f32 %v1896_v63, %v1863_v22 }
 0x502   :  { %v1929_v57 = vadd.f32 %v1928_v1, %v1897_v0 }
 0x504   :  { %v1996_v15 = vpop.f32.mrf.mxu3 }
 0x505   :  { %v1821_v18 = vpop.f32.mrf.mxu2 }
 0x506   :  { %v1867_v43 = vadd.f32 %v1866_v53, %v1821_v18 }
 0x508   :  { %v1902_v6 = vadd.f32 %v1901_v3, %v1867_v43 }
 0x50a   :  { %v1935_v19 = vadd.f32 %v1934_v12, %v1902_v6 }
 0x50c   :  { %v2000_v21 = vpop.f32.mrf.mxu3 }
 0x50d   :  { %v1967_v16 = vpop.f32.mrf.mxu2 }
 0x50e   :  { %v1968_v2 = vadd.f32 %v1967_v16, %v1929_v57 }
 0x510   :  { %v1997_v7 = vadd.f32 %v1996_v15, %v1968_v2 }
 0x512   :  { %v2036_v10 = vsel %vm610_vm12, %v1997_v7, 0 }
 0x513   :  { %v2058_v14 = vand.u32 4294901760, %v2036_v10 }
 0x515   :  { %v2059_v11 = vsub.f32 %v2036_v10, %v2058_v14  ;;  %v1971_v20 = vpop.f32.mrf.mxu2  ;;  %2097 = vmatmul.f32.vlgmr.msra.gmra.mxu1 %v2058_v14 }
 0x516   :  { %v1972_v36 = vadd.f32 %v1971_v20, %v1935_v19 }
 0x517   :  { %v2060_v23 = vand.u32 4294901760, %v2059_v11  ;;  %2125 = vmatmul.f32.vlgmr.msrb.gmra.mxu2 %v2059_v11 }
 0x518   :  { %v2001_v25 = vadd.f32 %v2000_v21, %v1972_v36 }
 0x519   :  { %2154 = vmatmul.f32.vlgmr.msrb.gmra.mxu3 %v2060_v23  ;;  %v2061_v32 = vsub.f32 %v2059_v11, %v2060_v23 }
 0x51a   :  { %v2039_v37 = vsel %vm610_vm12, %v2001_v25, 0 }
 0x51b   :  { %v2066_v13 = vand.u32 4294901760, %v2039_v37  ;;  %v2062_v38 = vand.u32 4294901760, %v2061_v32 }
 0x51d   :  { %2063 = vmatmul.f32.vlgmr.msra.gmra.mxu0 %v2062_v38  ;;  %2101 = vmatmul.f32.gmra.mxu1 %v2066_v13  ;;  %v2067_v61 = vsub.f32 %v2039_v37, %v2066_v13 }
 0x51f   :  { %2130 = vmatmul.f32.gmra.mxu2 %v2067_v61  ;;  %v2068_v39 = vand.u32 4294901760, %v2067_v61 }
 0x521   :  { %2160 = vmatmul.f32.gmra.mxu3 %v2068_v39  ;;  %v2069_v45 = vsub.f32 %v2067_v61, %v2068_v39 }
 0x523   :  { %v2070_v50 = vand.u32 4294901760, %v2069_v45 }
 0x525   :  { %2071 = vmatmul.f32.gmra.mxu0 %v2070_v50  ;;  %2210 = vmatmul.f32.vlgmr.msrb.gmra.mxu1 %v2058_v14 }
 0x52d   :  { %2184 = vmatmul.f32.vlgmr.msrb.gmra.mxu0 %v2058_v14  ;;  %2214 = vmatmul.f32.gmra.mxu1 %v2066_v13 }
 0x535   :  { %2188 = vmatmul.f32.gmra.mxu0 %v2066_v13 }
 0x592   :  { %v2098_v42 = vpop.f32.mrf.mxu1 }
 0x59a   :  { %v2064_v62 = vpop.f32.mrf.mxu0  ;;  %v2102_v30 = vpop.f32.mrf.mxu1 }
 0x59b   :  { %v2065_v4 = vadd.f32 %v2064_v62, %v2033_v26  ;;  %v2126_v35 = vpop.f32.mrf.mxu2 }
 0x59c   :  { %v2155_v63 = vpop.f32.mrf.mxu3 }
 0x59d   :  { %v2099_v34 = vadd.f32 %v2098_v42, %v2065_v4 }
 0x59f   :  { %v2127_v53 = vadd.f32 %v2126_v35, %v2099_v34 }
 0x5a1   :  { %v2156_v18 = vadd.f32 %v2155_v63, %v2127_v53 }
 0x5a2   :  { %v2072_v51 = vpop.f32.mrf.mxu0  ;;  %v2211_v1 = vpop.f32.mrf.mxu1 }
 0x5a3   :  { %v2073_v22 = vadd.f32 %v2072_v51, %v2034_v52  ;;  %v2131_v57 = vpop.f32.mrf.mxu2 }
 0x5a4   :  { %v2161_v3 = vpop.f32.mrf.mxu3 }
 0x5a5   :  { %v2103_v0 = vadd.f32 %v2102_v30, %v2073_v22 }
 0x5a7   :  { %v2132_v15 = vadd.f32 %v2131_v57, %v2103_v0 }
 0x5a9   :  { %v2162_v6 = vadd.f32 %v2161_v3, %v2132_v15 }
 0x5aa   :  { %v2185_v43 = vpop.f32.mrf.mxu0  ;;  %v2215_v14 = vpop.f32.mrf.mxu1 }
 0x5ab   :  { %v2186_v8 = vadd.f32 %v2185_v43, %v2156_v18 }
 0x5ad   :  { %v2212_v16 = vadd.f32 %v2211_v1, %v2186_v8 }
 0x5af   :  { %v2218_v2 = vadd.f32 %v2685_v5, %v2212_v16 }
 0x5b1   :  { %vm2220_vm1 = vcmp.gt.f32.partialorder %v2218_v2, 0.0  ;;  %v2222_v7 = vmul.f32 0.2, %v2218_v2 }
 0x5b2   :  { %v2189_v10 = vpop.f32.mrf.mxu0 }
 0x5b3   :  { %v2224_v12 = vsel %vm2220_vm1, %v2218_v2, %v2222_v7  ;;  %v2190_v9 = vadd.f32 %v2189_v10, %v2162_v6 }
 0x5b4   :  { %2269 = vst.msk [vmem:[%s2889_s10 + $0x30] sm:$0xff] %vm610_vm12, %v2224_v12 }
 0x5b5   :  { %v2216_v19 = vadd.f32 %v2215_v14, %v2190_v9 }
 0x5b7   :  { %v2219_v11 = vadd.f32 %v2685_v5, %v2216_v19 }
 0x5b9   :  { %vm2221_vm7 = vcmp.gt.f32.partialorder %v2219_v11, 0.0  ;;  %v2223_v20 = vmul.f32 0.2, %v2219_v11 }
 0x5bb   :  { %v2225_v36 = vsel %vm2221_vm7, %v2219_v11, %v2223_v20 }
 0x5bc   :  { %2270 = vst.msk [vmem:[%s2889_s10 + $0x38] sm:$0xff] %vm610_vm12, %v2225_v36 }

</bundles_post_ra>
